<compile_context>
chip_gen: v7x
topology: tpu7x:2x2x1
jax: 0.10.0
libtpu: 0.0.40
codegen_flags: <defaults>
</compile_context>

<pallas_src>
import functools
import math

import numpy as np
import jax
import jax.numpy as jnp
from jax.experimental import pallas as pl
from jax.experimental.pallas import tpu as pltpu


def _rup(x, m):
    return (x + m - 1) // m * m


def _pick_tm(m):
    # Single (ragged) tile for small M, 256/512 tiles for larger M.
    if m <= 512:
        return _rup(max(m, 8), 8)
    if m >= 2048:
        return 512
    return 256


# ----------------------------------------------------------------------------
# Fused matmul + folded-BN (scale, bias) + activation kernel
# bf16 MXU inputs, f32 VMEM accumulator, f32 epilogue.
# ----------------------------------------------------------------------------
def _mm_kernel(a_ref, w_ref, s_ref, b_ref, o_ref, acc_ref, *, k_steps, act):
    @pl.when(pl.program_id(2) == 0)
    def _():
        acc_ref[...] = jnp.zeros_like(acc_ref)

    acc_ref[...] += jnp.dot(a_ref[...], w_ref[...],
                            preferred_element_type=jnp.float32)

    @pl.when(pl.program_id(2) == k_steps - 1)
    def _():
        y = acc_ref[...] * s_ref[...] + b_ref[...]
        if act == "relu":
            y = jnp.maximum(y, 0.0)
        o_ref[...] = y.astype(o_ref.dtype)


def matmul_scale_bias(a, w, scale, bias, act="none", out_dtype=jnp.bfloat16):
    """out = act((a @ w) * scale + bias), per-output-channel scale/bias."""
    a = a.astype(jnp.bfloat16)
    w = w.astype(jnp.bfloat16)
    M, K = a.shape
    _, N = w.shape
    TM = _pick_tm(M)
    TN = 256 if N > 128 else 128
    TK = 256 if K > 128 else 128
    Mp, Kp, Np = _rup(M, TM), _rup(K, TK), _rup(N, TN)
    a_p = a if (Mp == M and Kp == K) else jnp.pad(a, ((0, Mp - M), (0, Kp - K)))
    w_p = w if (Kp == K and Np == N) else jnp.pad(w, ((0, Kp - K), (0, Np - N)))
    s_p = scale.reshape(1, N).astype(jnp.float32)
    b_p = bias.reshape(1, N).astype(jnp.float32)
    if Np != N:
        s_p = jnp.pad(s_p, ((0, 0), (0, Np - N)))
        b_p = jnp.pad(b_p, ((0, 0), (0, Np - N)))
    grid = (Mp // TM, Np // TN, Kp // TK)
    out = pl.pallas_call(
        functools.partial(_mm_kernel, k_steps=grid[2], act=act),
        out_shape=jax.ShapeDtypeStruct((Mp, Np), out_dtype),
        grid_spec=pltpu.PrefetchScalarGridSpec(
            num_scalar_prefetch=0, grid=grid,
            in_specs=[
                pl.BlockSpec((TM, TK), lambda i, j, k: (i, k)),
                pl.BlockSpec((TK, TN), lambda i, j, k: (k, j)),
                pl.BlockSpec((1, TN), lambda i, j, k: (0, j)),
                pl.BlockSpec((1, TN), lambda i, j, k: (0, j)),
            ],
            out_specs=pl.BlockSpec((TM, TN), lambda i, j, k: (i, j)),
            scratch_shapes=[pltpu.VMEM((TM, TN), jnp.float32)],
        ),
        compiler_params=pltpu.CompilerParams(
            dimension_semantics=("parallel", "parallel", "arbitrary")),
    )(a_p, w_p, s_p, b_p)
    if Mp != M or Np != N:
        out = out[:M, :N]
    return out


def grouped_matmul_scale_bias(a, wc, scale, bias, c2, act="relu"):
    """Grouped 3x3 conv (32 groups) as a compact matmul.

    a : im2col cols (M, 9*c2), tap-major channel layout (bf16).
    wc: compact weight (9*128, c2): each 128-wide output-channel tile j only
        needs input-channel chunk j of every tap, so the K grid axis has just
        9 steps (one per tap) instead of 9*c2/128 — no block-diagonal zero FLOPs.
    """
    a = a.astype(jnp.bfloat16)
    wc = wc.astype(jnp.bfloat16)
    M = a.shape[0]
    TM = _pick_tm(M)
    Mp = _rup(M, TM)
    a_p = a if Mp == M else jnp.pad(a, ((0, Mp - M), (0, 0)))
    cb = c2 // 128
    grid = (Mp // TM, cb, 9)
    s_p = scale.reshape(1, c2).astype(jnp.float32)
    b_p = bias.reshape(1, c2).astype(jnp.float32)
    out = pl.pallas_call(
        functools.partial(_mm_kernel, k_steps=9, act=act),
        out_shape=jax.ShapeDtypeStruct((Mp, c2), jnp.bfloat16),
        grid_spec=pltpu.PrefetchScalarGridSpec(
            num_scalar_prefetch=0, grid=grid,
            in_specs=[
                # A's K-block depends on both tap k and output tile j.
                pl.BlockSpec((TM, 128), lambda i, j, k: (i, k * cb + j)),
                pl.BlockSpec((128, 128), lambda i, j, k: (k, j)),
                pl.BlockSpec((1, 128), lambda i, j, k: (0, j)),
                pl.BlockSpec((1, 128), lambda i, j, k: (0, j)),
            ],
            out_specs=pl.BlockSpec((TM, 128), lambda i, j, k: (i, j)),
            scratch_shapes=[pltpu.VMEM((TM, 128), jnp.float32)],
        ),
        compiler_params=pltpu.CompilerParams(
            dimension_semantics=("parallel", "parallel", "arbitrary")),
    )(a_p, wc, s_p, b_p)
    return out if Mp == M else out[:M]


# ----------------------------------------------------------------------------
# MaxPool 3x3 / stride 2 / pad 1  (lane-dense: C=64 folded to 128 lanes)
# ----------------------------------------------------------------------------
def _maxpool_kernel(x_ref, o_ref):
    o_ref[...] = jnp.max(x_ref[...], axis=0)


def maxpool_3x3_s2_p1(x):
    N, H, W, C = x.shape
    Ho, Wo = (H + 2 - 3) // 2 + 1, (W + 2 - 3) // 2 + 1
    xp = jnp.pad(x, ((0, 0), (1, 1), (1, 1), (0, 0)),
                 constant_values=-jnp.inf)
    slabs = [xp[:, dy:dy + 2 * (Ho - 1) + 1:2, dx:dx + 2 * (Wo - 1) + 1:2, :]
             for dy in range(3) for dx in range(3)]
    st = jnp.stack(slabs, 0).reshape(9, N * Ho * Wo, C)
    M = N * Ho * Wo
    fold = 2 if (C < 128 and M % 2 == 0) else 1      # make output lane-dense
    M2, C2 = M // fold, C * fold
    st = st.reshape(9, M2, C2)
    R = 512
    Mp = _rup(M2, R)
    if Mp != M2:
        st = jnp.pad(st, ((0, 0), (0, Mp - M2), (0, 0)))
    out = pl.pallas_call(
        _maxpool_kernel,
        out_shape=jax.ShapeDtypeStruct((Mp, C2), x.dtype),
        grid_spec=pltpu.PrefetchScalarGridSpec(
            num_scalar_prefetch=0, grid=(Mp // R,),
            in_specs=[pl.BlockSpec((9, R, C2), lambda i: (0, i, 0))],
            out_specs=pl.BlockSpec((R, C2), lambda i: (i, 0)),
        ),
        compiler_params=pltpu.CompilerParams(
            dimension_semantics=("parallel",)),
    )(st)
    if Mp != M2:
        out = out[:M2]
    return out.reshape(N, Ho, Wo, C)


# ----------------------------------------------------------------------------
# Global average pool (== AvgPool2d(full spatial)); NHWC -> (N, C) in f32
# ----------------------------------------------------------------------------
def _avgpool_kernel(x_ref, o_ref):
    o_ref[...] = jnp.mean(x_ref[...].astype(jnp.float32), axis=1, keepdims=True)


def global_avgpool(x):
    N, H, W, C = x.shape
    xr = x.reshape(N, H * W, C)
    out = pl.pallas_call(
        _avgpool_kernel,
        out_shape=jax.ShapeDtypeStruct((N, 1, C), jnp.float32),
        grid_spec=pltpu.PrefetchScalarGridSpec(
            num_scalar_prefetch=0, grid=(N,),
            in_specs=[pl.BlockSpec((1, H * W, C), lambda i: (i, 0, 0))],
            out_specs=pl.BlockSpec((1, 1, C), lambda i: (i, 0, 0)),
        ),
        compiler_params=pltpu.CompilerParams(
            dimension_semantics=("parallel",)),
    )(xr)
    return out.reshape(N, C)


# ----------------------------------------------------------------------------
# Fused SE excitation MLP: sigmoid(relu(p @ w1 + b1) @ w2 + b2), single launch
# ----------------------------------------------------------------------------
def _se_fc_kernel(p_ref, w1_ref, b1_ref, w2_ref, b2_ref, o_ref):
    p = p_ref[...].astype(jnp.bfloat16)
    h = jnp.dot(p, w1_ref[...], preferred_element_type=jnp.float32)
    h = jnp.maximum(h + b1_ref[...], 0.0)
    s = jnp.dot(h.astype(jnp.bfloat16), w2_ref[...],
                preferred_element_type=jnp.float32)
    o_ref[...] = jax.nn.sigmoid(s + b2_ref[...])


def se_excitation(pooled, w1, b1, w2, b2):
    """pooled (N, C) f32; w1 (C, 128) bf16; b1 (1, 128); w2 (128, C) bf16; b2 (1, C)."""
    N, C = pooled.shape
    mid = w1.shape[1]
    Np = max(8, _rup(N, 8))
    p = pooled if Np == N else jnp.pad(pooled, ((0, Np - N), (0, 0)))
    out = pl.pallas_call(
        _se_fc_kernel,
        out_shape=jax.ShapeDtypeStruct((Np, C), jnp.float32),
        grid_spec=pltpu.PrefetchScalarGridSpec(
            num_scalar_prefetch=0, grid=(1,),
            in_specs=[
                pl.BlockSpec((Np, C), lambda i: (0, 0)),
                pl.BlockSpec((C, mid), lambda i: (0, 0)),
                pl.BlockSpec((1, mid), lambda i: (0, 0)),
                pl.BlockSpec((mid, C), lambda i: (0, 0)),
                pl.BlockSpec((1, C), lambda i: (0, 0)),
            ],
            out_specs=pl.BlockSpec((Np, C), lambda i: (0, 0)),
        ),
    )(p, w1, b1, w2, b2)
    return out[:N] if Np != N else out


# ----------------------------------------------------------------------------
# relu(orig * s + resid), s broadcast over spatial
# ----------------------------------------------------------------------------
def _se_scale_kernel(orig_ref, res_ref, s_ref, out_ref):
    o = orig_ref[...].astype(jnp.float32)
    r = res_ref[...].astype(jnp.float32)
    out_ref[...] = jnp.maximum(o * s_ref[...] + r, 0.0).astype(out_ref.dtype)


def se_scale_add_relu(orig, resid, s):
    N, H, W, C = orig.shape
    HW = H * W
    o = orig.reshape(N, HW, C)
    r = resid.reshape(N, HW, C)
    if HW > 1024:
        R = 512
        HWp = _rup(HW, R)
        o = jnp.pad(o, ((0, 0), (0, HWp - HW), (0, 0)))
        r = jnp.pad(r, ((0, 0), (0, HWp - HW), (0, 0)))
    else:
        R, HWp = HW, HW
    sv = s.reshape(N, 1, C).astype(jnp.float32)
    out = pl.pallas_call(
        _se_scale_kernel,
        out_shape=jax.ShapeDtypeStruct((N, HWp, C), orig.dtype),
        grid_spec=pltpu.PrefetchScalarGridSpec(
            num_scalar_prefetch=0, grid=(N, HWp // R),
            in_specs=[
                pl.BlockSpec((1, R, C), lambda b, i: (b, i, 0)),
                pl.BlockSpec((1, R, C), lambda b, i: (b, i, 0)),
                pl.BlockSpec((1, 1, C), lambda b, i: (b, 0, 0)),
            ],
            out_specs=pl.BlockSpec((1, R, C), lambda b, i: (b, i, 0)),
        ),
        compiler_params=pltpu.CompilerParams(
            dimension_semantics=("parallel", "parallel")),
    )(o, r, sv)
    if HWp != HW:
        out = out[:, :HW]
    return out.reshape(N, H, W, C)


# ----------------------------------------------------------------------------
# Conv glue: im2col + weight layout helpers
# ----------------------------------------------------------------------------
def im2col(x, kh, kw, stride, pad):
    N, H, W, C = x.shape
    xp = jnp.pad(x, ((0, 0), (pad, pad), (pad, pad), (0, 0)))
    Ho = (H + 2 * pad - kh) // stride + 1
    Wo = (W + 2 * pad - kw) // stride + 1
    cols = [xp[:, dy:dy + (Ho - 1) * stride + 1:stride,
               dx:dx + (Wo - 1) * stride + 1:stride, :]
            for dy in range(kh) for dx in range(kw)]
    return jnp.concatenate(cols, axis=-1), Ho, Wo


def conv_bn_act(x, w_dense, kh, kw, stride, pad, scale, bias, act,
                out_dtype=jnp.bfloat16):
    N, H, W, C = x.shape
    cols, Ho, Wo = im2col(x, kh, kw, stride, pad)
    A = cols.reshape(N * Ho * Wo, kh * kw * C)
    y = matmul_scale_bias(A, w_dense, scale, bias, act, out_dtype=out_dtype)
    return y.reshape(N, Ho, Wo, w_dense.shape[1])


def conv_weight(key, cout, cin, kh, kw):
    # Matches the module init: normal(0, sqrt(2 / (kh*kw*cout)))
    std = math.sqrt(2.0 / (kh * kw * cout))
    return jax.random.normal(key, (cout, cin, kh, kw), jnp.float32) * std


def dense_from_conv(w):
    # (Cout, Cin, kh, kw) -> (kh*kw*Cin, Cout), matching im2col (dy, dx, cin) order.
    cout, cin, kh, kw = w.shape
    return jnp.transpose(w, (2, 3, 1, 0)).reshape(kh * kw * cin, cout)


def compact_grouped_weight(w, groups, tile=128):
    """Grouped conv weight (cout, cin/groups, kh, kw) -> compact (kh*kw*tile, cout).

    Row (t*tile + l) holds the weight for tap t and input channel
    ((o // tile)*tile + l) of output channel o; only the cpg channels belonging
    to o's group are nonzero, so each 128-wide output tile reads exactly one
    contiguous 128-channel input chunk per tap.
    """
    w_np = np.asarray(jax.device_get(w), np.float32)
    cout, cpg, kh, kw = w_np.shape
    cog = cout // groups
    assert cog == cpg and cout % tile == 0 and tile % cpg == 0
    out = np.zeros((kh * kw * tile, cout), np.float32)
    for o in range(cout):
        g = o // cog
        local = g * cpg - (o // tile) * tile
        for t in range(kh * kw):
            dy, dx = divmod(t, kw)
            out[t * tile + local: t * tile + local + cpg, o] = w_np[o, :, dy, dx]
    return jnp.asarray(out)


def bn_scale_bias(c, eps=1e-5):
    # Inference-mode BN with PyTorch defaults: gamma=1, beta=0, mean=0, var=1.
    gamma = jnp.ones((c,), jnp.float32)
    beta = jnp.zeros((c,), jnp.float32)
    mean = jnp.zeros((c,), jnp.float32)
    var = jnp.ones((c,), jnp.float32)
    s = gamma / jnp.sqrt(var + eps)
    return s, beta - mean * s


# ----------------------------------------------------------------------------
# SE-ResNeXt bottleneck block (expansion = 4)
# ----------------------------------------------------------------------------
def init_block(key, inplanes, planes, stride, num_group):
    keys = jax.random.split(key, 6)
    c2, c4 = planes * 2, planes * 4
    p = {"stride": stride, "c2": c2}
    p["w1"] = dense_from_conv(conv_weight(keys[0], c2, inplanes, 1, 1)).astype(jnp.bfloat16)
    p["s1"], p["b1"] = bn_scale_bias(c2)
    wg = conv_weight(keys[1], c2, c2 // num_group, 3, 3)
    p["w2"] = compact_grouped_weight(wg, num_group).astype(jnp.bfloat16)
    p["s2"], p["b2"] = bn_scale_bias(c2)
    p["w3"] = dense_from_conv(conv_weight(keys[2], c4, c2, 1, 1)).astype(jnp.bfloat16)
    p["s3"], p["b3"] = bn_scale_bias(c4)
    # SE MLP: hidden dim zero-padded to 128 lanes (exact; padded units are dead).
    se_mid = max(1, round(planes / 4))
    midp = _rup(se_mid, 128)
    fc1 = jax.random.normal(keys[3], (c4, se_mid), jnp.float32) / math.sqrt(c4)
    fc2 = jax.random.normal(keys[4], (se_mid, c4), jnp.float32) / math.sqrt(se_mid)
    p["fc1_w"] = jnp.pad(fc1, ((0, 0), (0, midp - se_mid))).astype(jnp.bfloat16)
    p["fc1_b"] = jnp.zeros((1, midp), jnp.float32)
    p["fc2_w"] = jnp.pad(fc2, ((0, midp - se_mid), (0, 0))).astype(jnp.bfloat16)
    p["fc2_b"] = jnp.zeros((1, c4), jnp.float32)
    if stride != 1 or inplanes != c4:
        p["down_w"] = dense_from_conv(conv_weight(keys[5], c4, inplanes, 1, 1)).astype(jnp.bfloat16)
        p["down_s"], p["down_b"] = bn_scale_bias(c4)
    else:
        p["down_w"] = None
    return p


def bottleneck(x, p):
    stride, c2 = p["stride"], p["c2"]
    out = conv_bn_act(x, p["w1"], 1, 1, 1, 0, p["s1"], p["b1"], "relu")
    # grouped 3x3 conv (compact weight, tap-only K axis)
    cols, Ho, Wo = im2col(out, 3, 3, stride, 1)
    N = out.shape[0]
    A = cols.reshape(N * Ho * Wo, 9 * c2)
    out = grouped_matmul_scale_bias(A, p["w2"], p["s2"], p["b2"], c2, "relu")
    out = out.reshape(N, Ho, Wo, c2)
    out = conv_bn_act(out, p["w3"], 1, 1, 1, 0, p["s3"], p["b3"], "none")
    if p["down_w"] is not None:
        residual = conv_bn_act(x, p["down_w"], 1, 1, stride, 0,
                               p["down_s"], p["down_b"], "none")
    else:
        residual = x
    # Squeeze-and-Excite
    pooled = global_avgpool(out)                                   # (N, C4) f32
    s = se_excitation(pooled, p["fc1_w"], p["fc1_b"], p["fc2_w"], p["fc2_b"])
    return se_scale_add_relu(out, residual, s)


# ----------------------------------------------------------------------------
# Full network
# ----------------------------------------------------------------------------
def init_params(key, layers=(1, 1, 1, 1), num_classes=1000, num_group=32):
    nblk = sum(layers)
    keys = jax.random.split(key, 2 + nblk)
    stem_w = dense_from_conv(conv_weight(keys[0], 64, 3, 7, 7)).astype(jnp.bfloat16)
    stem_s, stem_b = bn_scale_bias(64)
    params = {"stem": {"w": stem_w, "s": stem_s, "b": stem_b}}
    blocks = []
    inplanes = 64
    ki = 1
    for li, (planes, n) in enumerate(zip((64, 128, 256, 512), layers)):
        layer_stride = 1 if li == 0 else 2
        for b in range(n):
            s = layer_stride if b == 0 else 1
            blocks.append(init_block(keys[ki], inplanes, planes, s, num_group))
            inplanes = planes * 4
            ki += 1
    params["blocks"] = blocks
    params["fc_w"] = (jax.random.normal(keys[ki], (512 * 4, num_classes), jnp.float32)
                      / math.sqrt(512 * 4)).astype(jnp.bfloat16)
    params["fc_b"] = jnp.zeros((num_classes,), jnp.float32)
    return params


def forward(params, x_nchw):
    x = jnp.transpose(x_nchw, (0, 2, 3, 1)).astype(jnp.bfloat16)   # NCHW -> NHWC bf16
    st = params["stem"]
    x = conv_bn_act(x, st["w"], 7, 7, 2, 3, st["s"], st["b"], "relu")   # conv1+bn1+relu
    x = maxpool_3x3_s2_p1(x)
    for p in params["blocks"]:                                     # layer1..layer4
        x = bottleneck(x, p)
    pooled = global_avgpool(x)               # AvgPool2d(7, stride=1) on 7x7 + flatten
    ones = jnp.ones((params["fc_w"].shape[1],), jnp.float32)
    logits = matmul_scale_bias(pooled.astype(jnp.bfloat16), params["fc_w"],
                               ones, params["fc_b"], "none",
                               out_dtype=jnp.float32)
    return logits


if __name__ == "__main__":
    key = jax.random.PRNGKey(0)
    pkey, xkey = jax.random.split(key)
    # layers is a constructor argument; use a shallow config to keep the demo small.
    params = init_params(pkey, layers=(1, 1, 1, 1), num_classes=1000, num_group=32)
    # Input must be 3x224x224 so that layer4 output is 7x7 (AvgPool2d(7) requirement).
    x = jax.random.normal(xkey, (2, 3, 224, 224), jnp.float32)
    logits = forward(params, x)
    jax.block_until_ready(logits)
    assert logits.shape == (2, 1000)
    assert bool(jnp.all(jnp.isfinite(logits)))
    print("KERNEL_OK")
</pallas_src>

<mosaic_0001>
module attributes {stable_mosaic.version = 11 : i64} {
  func.func @_mm_kernel(%arg0: i32, %arg1: i32, %arg2: i32, %arg3: memref<512x256xbf16, #tpu.memory_space<vmem>>, %arg4: memref<256x128xbf16, #tpu.memory_space<vmem>>, %arg5: memref<1x128xf32, #tpu.memory_space<vmem>>, %arg6: memref<1x128xf32, #tpu.memory_space<vmem>>, %arg7: memref<512x128xbf16, #tpu.memory_space<vmem>>, %arg8: memref<512x128xf32, #tpu.memory_space<vmem>>) attributes {dimension_semantics = [#tpu.dimension_semantics<parallel>, #tpu.dimension_semantics<parallel>, #tpu.dimension_semantics<arbitrary>], iteration_bounds = array<i64: 49, 1, 1>, scalar_prefetch = 0 : i64, scratch_operands = 1 : i64, tpu.core_type = #tpu.core_type<tc>, window_params = [{transform_indices = @transform_0, window_bounds = array<i64: 512, 256>}, {transform_indices = @transform_1, window_bounds = array<i64: 256, 128>}, {transform_indices = @transform_2, window_bounds = array<i64: 1, 128>}, {transform_indices = @transform_3, window_bounds = array<i64: 1, 128>}, {transform_indices = @transform_4, window_bounds = array<i64: 512, 128>}]} {
    %c0_i32 = arith.constant 0 : i32
    %0 = arith.cmpi eq, %arg2, %c0_i32 : i32
    %1 = arith.extui %0 : i1 to i32
    %c0_i32_0 = arith.constant 0 : i32
    %2 = arith.cmpi ne, %1, %c0_i32_0 : i32
    scf.if %2 {
      %cst_10 = arith.constant 0.000000e+00 : f32
      %12 = vector.broadcast %cst_10 : f32 to vector<512x128xf32>
      %c0_11 = arith.constant 0 : index
      %c0_12 = arith.constant 0 : index
      %13 = vector.load %arg8[%c0_11, %c0_12] : memref<512x128xf32, #tpu.memory_space<vmem>>, vector<512x128xf32>
      tpu.vector_store %arg8[%c0_11, %c0_12], %12 {strides = array<i32>} : memref<512x128xf32, #tpu.memory_space<vmem>>, vector<512x128xf32>,
    } else {
    }
    %c0 = arith.constant 0 : index
    %c0_1 = arith.constant 0 : index
    %3 = vector.load %arg8[%c0, %c0_1] : memref<512x128xf32, #tpu.memory_space<vmem>>, vector<512x128xf32>
    %c0_2 = arith.constant 0 : index
    %c0_3 = arith.constant 0 : index
    %4 = vector.load %arg3[%c0_2, %c0_3] : memref<512x256xbf16, #tpu.memory_space<vmem>>, vector<512x256xbf16>
    %c0_4 = arith.constant 0 : index
    %c0_5 = arith.constant 0 : index
    %5 = vector.load %arg4[%c0_4, %c0_5] : memref<256x128xbf16, #tpu.memory_space<vmem>>, vector<256x128xbf16>
    %cst = arith.constant dense<0.000000e+00> : vector<512x128xf32>
    %6 = tpu.matmul %4, %5, %cst {dimension_numbers = #tpu.dot_dimension_numbers<[1], [0], [0], [1], [0, 0, 1, 1], [], []>} : vector<512x256xbf16>, vector<256x128xbf16>, vector<512x128xf32> -> vector<512x128xf32>
    %7 = arith.addf %3, %6 : vector<512x128xf32>
    %c0_6 = arith.constant 0 : index
    %c0_7 = arith.constant 0 : index
    %8 = vector.load %arg8[%c0_6, %c0_7] : memref<512x128xf32, #tpu.memory_space<vmem>>, vector<512x128xf32>
    tpu.vector_store %arg8[%c0_6, %c0_7], %7 {strides = array<i32>} : memref<512x128xf32, #tpu.memory_space<vmem>>, vector<512x128xf32>,
    %c0_i32_8 = arith.constant 0 : i32
    %9 = arith.cmpi eq, %arg2, %c0_i32_8 : i32
    %10 = arith.extui %9 : i1 to i32
    %c0_i32_9 = arith.constant 0 : i32
    %11 = arith.cmpi ne, %10, %c0_i32_9 : i32
    scf.if %11 {
      %c0_10 = arith.constant 0 : index
      %c0_11 = arith.constant 0 : index
      %12 = vector.load %arg8[%c0_10, %c0_11] : memref<512x128xf32, #tpu.memory_space<vmem>>, vector<512x128xf32>
      %c0_12 = arith.constant 0 : index
      %c0_13 = arith.constant 0 : index
      %13 = vector.load %arg5[%c0_12, %c0_13] : memref<1x128xf32, #tpu.memory_space<vmem>>, vector<1x128xf32>
      %14 = vector.broadcast %13 : vector<1x128xf32> to vector<512x128xf32>
      %15 = arith.mulf %12, %14 : vector<512x128xf32>
      %c0_14 = arith.constant 0 : index
      %c0_15 = arith.constant 0 : index
      %16 = vector.load %arg6[%c0_14, %c0_15] : memref<1x128xf32, #tpu.memory_space<vmem>>, vector<1x128xf32>
      %17 = vector.broadcast %16 : vector<1x128xf32> to vector<512x128xf32>
      %18 = arith.addf %15, %17 : vector<512x128xf32>
      %cst_16 = arith.constant 0.000000e+00 : f32
      %19 = vector.broadcast %cst_16 : f32 to vector<512x128xf32>
      %20 = arith.maximumf %18, %19 : vector<512x128xf32>
      %21 = arith.truncf %20 : vector<512x128xf32> to vector<512x128xbf16>
      %c0_17 = arith.constant 0 : index
      %c0_18 = arith.constant 0 : index
      %22 = vector.load %arg7[%c0_17, %c0_18] : memref<512x128xbf16, #tpu.memory_space<vmem>>, vector<512x128xbf16>
      tpu.vector_store %arg7[%c0_17, %c0_18], %21 {strides = array<i32>} : memref<512x128xbf16, #tpu.memory_space<vmem>>, vector<512x128xbf16>,
    } else {
    }
    return
  }
  func.func @transform_0(%arg0: i32, %arg1: i32, %arg2: i32) -> (i32, i32) {
    %c0_i32 = arith.constant 0 : i32
    return %arg0, %arg2 : i32, i32
  }
  func.func @transform_1(%arg0: i32, %arg1: i32, %arg2: i32) -> (i32, i32) {
    %c0_i32 = arith.constant 0 : i32
    return %arg2, %arg1 : i32, i32
  }
  func.func @transform_2(%arg0: i32, %arg1: i32, %arg2: i32) -> (i32, i32) {
    %c0_i32 = arith.constant 0 : i32
    %c0_i32_0 = arith.constant 0 : i32
    return %c0_i32, %arg1 : i32, i32
  }
  func.func @transform_3(%arg0: i32, %arg1: i32, %arg2: i32) -> (i32, i32) {
    %c0_i32 = arith.constant 0 : i32
    %c0_i32_0 = arith.constant 0 : i32
    return %c0_i32, %arg1 : i32, i32
  }
  func.func @transform_4(%arg0: i32, %arg1: i32, %arg2: i32) -> (i32, i32) {
    %c0_i32 = arith.constant 0 : i32
    return %arg0, %arg1 : i32, i32
  }
}

</mosaic_0001>

<bundles_post_ra>
// kernel: tpu_custom_call.1
= control target key start
LH: loop header
LB: loop body
LE: loop exit
PB: predicated region body
PF: predicated region fallthrough
CT: control target
= control target key end

     0   :  { %9 = vsyncpa [#allocation4], 0  ;;  %s3565_s0 = inlined_call_operand.hbm [shape: bf16[25088,256], index: 0, kind: input, shape index: {}]   ;;  %s3566_s1 = inlined_call_operand.hbm [shape: bf16[256,128], index: 1, kind: input, shape index: {}]   ;;  %s3567_s2 = inlined_call_operand.hbm [shape: f32[1,128], index: 2, kind: input, shape index: {}]   ;;  %s3568_s3 = inlined_call_operand.hbm [shape: f32[1,128], index: 3, kind: input, shape index: {}]   ;;  %s3569_s4 = inlined_call_operand.hbm [shape: bf16[25088,128], index: 4, kind: output, shape index: {}]  }
   0x1   :  { %11 = vsyncpa [#allocation4 + $0x1], 0 }
   0x2   :  { %12 = vsyncpa [#allocation7], 0 }
   0x3   :  { %13 = vsyncpa [#allocation10], 0 }
   0x4   :  { %14 = vsyncpa [#allocation5], 0 }
   0x5   :  { %16 = vsyncpa [#allocation5 + $0x1], 0  ;;  %s3020_s15 = smov 0   ;;  %s3022_s16 = smov 0  }
   0x6   :  { %s3024_s17 = smov 0   ;;  %s3026_s18 = smov 0  }
   0x7   :  { %s3028_s19 = smov 0   ;;  %s3030_s20 = smov 0  }
   0x8 LB: > { %s2107_s21 = sadd.s32 4294967295, %s2981_s20   ;;  %s2108_s22 = sadd.s32 4294967294, %s2981_s20   ;;  %s2981_s20 = sphi %s3030_s20, %s22_s20   ;;  %s2977_s19 = sphi %s3028_s19, %s3595_s19   ;;  %s2973_s18 = sphi %s3026_s18, %s3594_s18   ;;  %s2969_s17 = sphi %s3024_s17, %s3593_s17   ;;  %s2965_s16 = sphi %s3022_s16, %s3592_s16   ;;  %s2961_s15 = sphi %s3020_s15, %s3591_s15  }
   0x9   : > { %p63_p0 = scmp.ne.s32.totalorder %s2965_s16, %s2961_s15  ;;  %p3054_p1 = scmp.eq.s32.totalorder %s2107_s21, 0 }
   0xa   : > { %p3058_p2 = scmp.eq.s32.totalorder %s2107_s21, 48  ;;  %p175_p3 = scmp.eq.s32.totalorder %s2108_s22, 48 }
   0xb   : > { %s3575_s23 = scalar_select %p3054_p1, 1, 0 }
   0xc   : > { %s3576_s24 = scalar_select %p3058_p2, 1, 0 }
   0xd   : > { %p3064_p4 = por %p3054_p1, %p63_p0  ;;  %p2109_p5 = scmp.ge.s32.totalorder %s2981_s20, 1 }
   0xe   : > { %p3069_p6 = por %p175_p3, %p63_p0  ;;  %p182_p7 = scmp.lt.s32.totalorder %s2981_s20, 50 }
   0xf   : > { %s3577_s25 = scalar_select %p3064_p4, 1, 0 }
  0x10   : > { %s3578_s26 = scalar_select %p3069_p6, 1, 0 }
  0x11   : > { %p3074_p8 = pnand %p2109_p5, %p182_p7  ;;  %s2983_s28 = smov [#allocation6]  }
  0x12   : > { %3579 = sst [smem:[#allocation16_spill]] %s3578_s26  ;;  %s198_s29 = sshll.u32 %s2983_s28, 4  ;;  %s3078_s29 = int_to_ptr.vmem [resolvable:$true] %s198_s29 }
  0x13   : > { %s3580_s27 = scalar_select %p3074_p8, 1, 0 }
  0x14   : > { %p2581_p9 = pneg %p3074_p8  ;;  %s2984_s5 = smov [#allocation8]  }
  0x15   : > { %s214_s6 = sshll.u32 %s2984_s5, 4  ;;  %s2985_s7 = smov [#allocation9]   ;;  %s3088_s6 = int_to_ptr.vmem [resolvable:$true] %s214_s6 }
  0x16   : > { %p3084_p10 = pnand %p2581_p9, %p3054_p1  ;;  %s3090_s8 = sshll.u32 %s2985_s7, 4  ;;  %s228_s8 = int_to_ptr.vmem [resolvable:$true] %s3090_s8 }
  0x17   : > { %s2777_s11 = scalar_lea.hbm %s3566_s1, 2048 }
  0x18   : > { %p2778_p11 = scmp.ne.s32.totalorder %s3566_s1, %s2777_s11  ;;  %p3100_p12 = pneg %p3084_p10 }
  0x19   : > { %p2784_p3 = scmp.lt.u32.totalorder %s2777_s11, %s3566_s1 }
  0x1a   : > { %p2780_p13 = pnand %p3100_p12, %p2778_p11 }
  0x1c   : > { %p2781_p0 = pneg %p2780_p13 }
  0x1e   : > { %p2786_p5 = pnand %p2784_p3, %p2781_p0 }
  0x20   : > { %2789 = shalt.err (!%p2786_p5)
}
  0x21   : > { %s2790_s28 = scalar_lea.vmem %s3078_s29, 2048  ;;  %p2798_p1 = scmp.lt.s32.totalorder %s3078_s29, %s3078_s29 }
  0x22   : > { %p2791_p7 = scmp.ne.s32.totalorder %s3078_s29, %s2790_s28  ;;  %p2799_p4 = scmp.lt.s32.totalorder %s2790_s28, %s2790_s28 }
  0x24   : > { %p2793_p9 = pnand %p2791_p7, %p3100_p12  ;;  %p2800_p11 = por %p2799_p4, %p2798_p1 }
  0x26   : > { %p2794_p6 = pneg %p2793_p9 }
  0x28   : > { %p2801_p13 = pnand %p2800_p11, %p2794_p6 }
  0x2a   : > { %2804 = shalt.err (!%p2801_p13)
}
  0x2b   : > { %s2986_s5 = smov 64   ;;  %s2987_s7 = smov 4  }
  0x2c   : > { %2584 = dma.hbm_to_vmem [thread:$0]  (!%p3084_p10), %s3566_s1, 2048, %s3078_s29, [#allocation7], %s2986_s5, %s2986_s5, %s2987_s7  }
  0x2d   : > { %s2805_s13 = scalar_lea.hbm %s3567_s2, 16 }
  0x2e   : > { %p2806_p1 = scmp.ne.s32.totalorder %s3567_s2, %s2805_s13  ;;  %p2812_p0 = scmp.lt.u32.totalorder %s2805_s13, %s3567_s2 }
  0x30   : > { %p2808_p4 = pnand %p2806_p1, %p3100_p12 }
  0x32   : > { %p2809_p6 = pneg %p2808_p4 }
  0x34   : > { %p2814_p3 = pnand %p2812_p0, %p2809_p6 }
  0x36   : > { %2817 = shalt.err (!%p2814_p3)
}
  0x37   : > { %s2818_s29 = scalar_lea.vmem %s3088_s6, 16  ;;  %s2825_s5 = scalar_lea.vmem %s3088_s6, 32 }
  0x38   : > { %p2819_p5 = scmp.ne.s32.totalorder %s3088_s6, %s2818_s29  ;;  %p2826_p11 = scmp.lt.s32.totalorder %s3088_s6, %s3088_s6 }
  0x39   : > { %p2827_p13 = scmp.lt.s32.totalorder %s2825_s5, %s2818_s29 }
  0x3a   : > { %p2821_p7 = pnand %p2819_p5, %p3100_p12 }
  0x3b   : > { %p2828_p1 = por %p2827_p13, %p2826_p11 }
  0x3c   : > { %p2822_p9 = pneg %p2821_p7 }
  0x3e   : > { %p2829_p4 = pnand %p2828_p1, %p2822_p9 }
  0x40   : > { %2832 = shalt.err (!%p2829_p4)
}
  0x41   : > { %2587 = dma.hbm_to_vmem [thread:$0]  (!%p3084_p10), %s3567_s2, 16, %s3088_s6, [#allocation7]  }
  0x42   : > { %s2833_s11 = scalar_lea.hbm %s3568_s3, 16 }
  0x43   : > { %p2834_p6 = scmp.ne.s32.totalorder %s3568_s3, %s2833_s11  ;;  %p2840_p5 = scmp.lt.u32.totalorder %s2833_s11, %s3568_s3 }
  0x45   : > { %p2836_p0 = pnand %p2834_p6, %p3100_p12 }
  0x47   : > { %p2837_p3 = pneg %p2836_p0 }
  0x49   : > { %p2842_p7 = pnand %p2840_p5, %p2837_p3 }
  0x4b   : > { %2845 = shalt.err (!%p2842_p7)
}
  0x4c   : > { %s2846_s28 = scalar_lea.vmem %s228_s8, 16  ;;  %s2853_s6 = scalar_lea.vmem %s228_s8, 32 }
  0x4d   : > { %p2847_p9 = scmp.ne.s32.totalorder %s228_s8, %s2846_s28  ;;  %p2854_p1 = scmp.lt.s32.totalorder %s228_s8, %s228_s8 }
  0x4e   : > { %p2855_p4 = scmp.lt.s32.totalorder %s2853_s6, %s2846_s28 }
  0x4f   : > { %p2849_p11 = pnand %p2847_p9, %p3100_p12 }
  0x50   : > { %p2856_p8 = por %p2855_p4, %p2854_p1 }
  0x51   : > { %p2850_p13 = pneg %p2849_p11 }
  0x53   : > { %p2857_p2 = pnand %p2856_p8, %p2850_p13 }
  0x55   : > { %2860 = shalt.err (!%p2857_p2)
}
  0x56   : > { %2590 = dma.hbm_to_vmem [thread:$0]  (!%p3084_p10), %s3568_s3, 16, %s228_s8, [#allocation10]  }
  0x57   : > { %s50_s14 = sadd.s32 1, %s2969_s17  ;;  %s41_s26 = sadd.s32 1, %s2977_s19 }
  0x58   : > { %p57_p2 = scmp.ne.s32.totalorder %s2969_s17, %s2965_s16  ;;  %p43_p8 = scmp.ge.s32.totalorder %s41_s26, 49 }
  0x59   : > { %p58_p12 = scmp.eq.s32.totalorder %s2981_s20, 0  ;;  %p3583_p6 = scmp.ne.s32.totalorder %s3576_s24, 0 }
  0x5a   : > { %p2602_p3 = scmp.lt.s32.totalorder %s2981_s20, 49  ;;  %s3597_s26 = smov (%p43_p8, %s41_s26), 0 }
  0x5b   : > { %p3171_p0 = por %p3583_p6, %p57_p2  ;;  %p59_p5 = por %p58_p12, %p57_p2 }
  0x5c   : > { %s238_s7 = sand.u32 1, %s2969_s17   ;;  %s45_s9 = ssub.s32 %s2977_s19, %s3597_s26 }
  0x5d   : > { %p48_p7 = scmp.eq.s32.totalorder %s45_s9, 0  ;;  %s2114_s8 = sshll.u32 %s238_s7, 9 }
  0x5e   : > { %s2276_s10 = sshll.u32 %s2977_s19, 13  ;;  %s242_s21 = scalar_lea.vmem [#allocation3], %s2114_s8 }
  0x5f   : > { %s3183_s11 = scalar_select %p48_p7, %s2969_s17, %s50_s14  }
  0x60   : > { %s3188_s24 = scalar_lea.hbm %s3565_s0, %s2276_s10  ;;  %s252_s22 = sshll.u32 %s242_s21, 4  ;;  %s3190_s22 = int_to_ptr.vmem [resolvable:$true] %s252_s22 }
  0x61   : > { %p3194_p10 = pnand %p2602_p3, %p59_p5  ;;  %s3198_s6 = scalar_lea.sflag [#allocation4], %s238_s7 }
  0x62   : > { %s2861_s29 = scalar_lea.hbm %s3188_s24, 8192  ;;  %s2866_s9 = scalar_lea.hbm %s3565_s0, 401408 }
  0x63   : > { %p2862_p9 = scmp.ne.s32.totalorder %s3188_s24, %s2861_s29  ;;  %p2863_p11 = pneg %p3194_p10 }
  0x64   : > { %p2867_p4 = scmp.lt.u32.totalorder %s3188_s24, %s3565_s0  ;;  %p2868_p2 = scmp.lt.u32.totalorder %s2866_s9, %s2861_s29 }
  0x65   : > { %p2864_p13 = pnand %p2863_p11, %p2862_p9  ;;  %p2870_p12 = scmp.lt.u32.totalorder %s2861_s29, %s3188_s24 }
  0x66   : > { %p2869_p8 = por %p2868_p2, %p2867_p4 }
  0x67   : > { %p2865_p1 = pneg %p2864_p13 }
  0x68   : > { %p2871_p6 = por %p2870_p12, %p2869_p8 }
  0x6a   : > { %p2872_p3 = pnand %p2871_p6, %p2865_p1 }
  0x6c   : > { %2875 = shalt.err (!%p2872_p3)
}
  0x6d   : > { %s2876_s7 = scalar_lea.vmem %s3190_s22, 8192  ;;  %s2988_s12 = smov [#allocation3]  }
  0x6e   : > { %p2877_p5 = scmp.ne.s32.totalorder %s3190_s22, %s2876_s7  ;;  %s2881_s13 = sshll.u32 %s2988_s12, 4  ;;  %s2882_s13 = int_to_ptr.vmem [resolvable:$false] %s2881_s13 }
  0x6f   : > { %s2883_s21 = scalar_lea.vmem %s2882_s13, 16384  ;;  %p2884_p13 = scmp.lt.s32.totalorder %s3190_s22, %s2882_s13 }
  0x70   : > { %p2879_p7 = pnand %p2877_p5, %p2863_p11  ;;  %p2885_p4 = scmp.lt.s32.totalorder %s2883_s21, %s2876_s7 }
  0x72   : > { %p2880_p9 = pneg %p2879_p7  ;;  %p2886_p2 = por %p2885_p4, %p2884_p13 }
  0x74   : > { %p2887_p8 = pnand %p2886_p2, %p2880_p9 }
  0x76   : > { %2890 = shalt.err (!%p2887_p8)
}
  0x77   : > { %s2989_s29 = smov 128   ;;  %s2990_s5 = smov 8  }
  0x78   : > { %2594 = dma.hbm_to_vmem [thread:$0]  (!%p3194_p10), %s3188_s24, 8192, %s3190_s22, %s3198_s6, %s2989_s29, %s2989_s29, %s2990_s5  }
  0x79   : > { %p3586_p11 = scmp.ne.s32.totalorder %s3580_s27, 0 }
  0x7a   : > { %s3229_s14 = sand.u32 (!%p3586_p11), 1, %s2965_s16   ;;  %p3587_p1 = scmp.ne.s32.totalorder (!%p3586_p11), %s3577_s25, 0 }
  0x7b   : > { %264 = sbr.rel (%p3586_p11) target bundleno = 559 (0x22f), region = 36  ;;  %s2119_s9 = sshll.u32 (!%p3586_p11), %s3229_s14, 9 }
  0x7c   : > { %s267_s8 = scalar_lea.sflag (!%p3586_p11), [#allocation4], %s3229_s14  ;;  %s3233_s10 = scalar_lea.vmem (!%p3586_p11), [#allocation3], %s2119_s9 }
  0x82   : > { %2944 = dma.done.wait (%p3587_p1), %s267_s8, 8192  }
  0x83   : > { %2946 = vsyncadd (%p3587_p1), %s267_s8, 4294959104  ;;  %p3588_p10 = scmp.ne.s32.totalorder %s3575_s23, 0 }
  0x85   : > { %2948 = dma.done.wait (%p3588_p10), [#allocation7], 2064  }
  0x86   : > { %2950 = vsyncadd (%p3588_p10), [#allocation7], 4294965232 }
  0x87   : > { %2952 = dma.done.wait (%p3588_p10), [#allocation10], 16  }
  0x88   : > { %2954 = vsyncadd (%p3588_p10), [#allocation10], 4294967280  ;;  %v2991_v0 = vmov 0   ;;  %v2665_v1 = vld [vmem:[#allocation6] sm:$0xff]   ;;  %v2666_v2 = vld [vmem:[#allocation6 + $0x8] sm:$0xff]   ;;  %s2123_s23 = sshll.u32 %s3229_s14, 8 }
  0x89   : > { %956 = vmatprep.subr.bf16.mxu0 %v2991_v0  ;;  %2533 = vmatprep.subr.bf16.mxu1 %v2991_v0  ;;  %v2667_v3 = vld [vmem:[#allocation6 + $0x10] sm:$0xff]   ;;  %v2668_v4 = vld [vmem:[#allocation6 + $0x18] sm:$0xff]   ;;  %v2669_v5 = vld [vmem:[#allocation6 + $0x20] sm:$0xff]   ;;  %s3358_s25 = scalar_lea.vmem [#allocation11], %s2123_s23  ;;  %s2341_s27 = sshll.u32 %s2973_s18, 12 }
  0x8a   : > { %957 = vmatpush1.bf16.msra.mxu0 %v2665_v1  ;;  %2549 = vmatpush1.bf16.msra.mxu1 %v2665_v1  ;;  %v2683_v6 = vld [vmem:[%s3233_s10 + $0x4] ss:$8 sps:$4 sm:$0xff]   ;;  %v2671_v9 = vld [vmem:[#allocation6 + $0x30] sm:$0xff]   ;;  %v2672_v10 = vld [vmem:[#allocation6 + $0x38] sm:$0xff]   ;;  %s1981_s24 = sshll.u32 %s3358_s25, 4  ;;  %s3513_s6 = scalar_lea.hbm %s3569_s4, %s2341_s27  ;;  %s3515_s24 = int_to_ptr.vmem [resolvable:$true] %s1981_s24 }
  0x8b   : > { %958 = vmatprep.subr.bf16.mxu0 %v2991_v0  ;;  %2534 = vmatprep.subr.bf16.mxu1 %v2991_v0  ;;  %v2670_v7 = vld [vmem:[#allocation6 + $0x28] sm:$0xff]   ;;  %v2673_v11 = vld [vmem:[#allocation6 + $0x40] sm:$0xff]   ;;  %v2675_v13 = vld [vmem:[#allocation6 + $0x50] sm:$0xff]   ;;  %s1967_s18 = scalar_lea.sflag [#allocation5], %s3229_s14  ;;  %s2891_s7 = scalar_lea.vmem %s3515_s24, 4096 }
  0x8c   : > { %v2686_v8 = vld [vmem:[%s3233_s10 + $0x104] ss:$8 sps:$4 sm:$0xff]   ;;  %988 = vmatprep.mubr.bf16.mxu0 %v2683_v6  ;;  %v2676_v14 = vld [vmem:[#allocation6 + $0x58] sm:$0xff]   ;;  %v2679_v17 = vld [vmem:[#allocation6 + $0x70] sm:$0xff]   ;;  %p2892_p12 = scmp.ne.s32.totalorder %s3515_s24, %s2891_s7  ;;  %s2992_s12 = smov [#allocation11]  }
  0x8d   : > { %1116 = vmatprep.mubr.bf16.mxu1 %v2686_v8  ;;  %v2674_v12 = vld [vmem:[#allocation6 + $0x48] sm:$0xff]   ;;  %v2677_v15 = vld [vmem:[#allocation6 + $0x60] sm:$0xff]   ;;  %v2680_v18 = vld [vmem:[#allocation6 + $0x78] sm:$0xff]   ;;  %s2895_s13 = sshll.u32 %s2992_s12, 4  ;;  %s2896_s13 = int_to_ptr.vmem [resolvable:$false] %s2895_s13 }
  0x8e   : > { %959 = vmatpush1.bf16.msra.mxu0 %v2666_v2  ;;  %2550 = vmatpush1.bf16.msra.mxu1 %v2666_v2  ;;  %v2678_v16 = vld [vmem:[#allocation6 + $0x68] sm:$0xff]   ;;  %v2687_v21 = vld [vmem:[%s3233_s10 + $0x14] ss:$8 sps:$4 sm:$0xff]   ;;  %v2691_v23 = vld [vmem:[%s3233_s10 + $0x10] ss:$8 sps:$4 sm:$0xff]   ;;  %p2893_p6 = pnand %p2892_p12, %p3171_p0  ;;  %s2897_s21 = scalar_lea.vmem %s2896_s13, 8192 }
  0x8f   : > { %960 = vmatprep.subr.bf16.mxu0 %v2991_v0  ;;  %2535 = vmatprep.subr.bf16.mxu1 %v2991_v0  ;;  %v2681_v19 = vld [vmem:[%s3233_s10] ss:$8 sps:$4 sm:$0xff]   ;;  %v2689_v22 = vld [vmem:[%s3233_s10 + $0x114] ss:$8 sps:$4 sm:$0xff]   ;;  %v2692_v24 = vld [vmem:[%s3233_s10 + $0x110] ss:$8 sps:$4 sm:$0xff]   ;;  %p2898_p5 = scmp.lt.s32.totalorder %s3515_s24, %s2896_s13  ;;  %p2899_p7 = scmp.lt.s32.totalorder %s2897_s21, %s2891_s7 }
  0x90   : > { %v2684_v20 = vld [vmem:[%s3233_s10 + $0x100] ss:$8 sps:$4 sm:$0xff]   ;;  %v2693_v25 = vld [vmem:[%s3233_s10 + $0x24] ss:$8 sps:$4 sm:$0xff]   ;;  %v2699_v29 = vld [vmem:[%s3233_s10 + $0x34] ss:$8 sps:$4 sm:$0xff]   ;;  %p2894_p3 = pneg %p2893_p6 }
  0x91   : > { %v2695_v26 = vld [vmem:[%s3233_s10 + $0x124] ss:$8 sps:$4 sm:$0xff]   ;;  %v2697_v27 = vld [vmem:[%s3233_s10 + $0x20] ss:$8 sps:$4 sm:$0xff]   ;;  %v2701_v30 = vld [vmem:[%s3233_s10 + $0x134] ss:$8 sps:$4 sm:$0xff]   ;;  %p2900_p9 = por %p2899_p7, %p2898_p5 }
  0x92   : > { %961 = vmatpush1.bf16.msra.mxu0 %v2667_v3  ;;  %2551 = vmatpush1.bf16.msra.mxu1 %v2667_v3  ;;  %v2698_v28 = vld [vmem:[%s3233_s10 + $0x120] ss:$8 sps:$4 sm:$0xff]   ;;  %v2703_v31 = vld [vmem:[%s3233_s10 + $0x30] ss:$8 sps:$4 sm:$0xff]   ;;  %v2705_v33 = vld [vmem:[%s3233_s10 + $0x44] ss:$8 sps:$4 sm:$0xff]  }
  0x93   : > { %962 = vmatprep.subr.bf16.mxu0 %v2991_v0  ;;  %2536 = vmatprep.subr.bf16.mxu1 %v2991_v0  ;;  %v2704_v32 = vld [vmem:[%s3233_s10 + $0x130] ss:$8 sps:$4 sm:$0xff]   ;;  %v2707_v34 = vld [vmem:[%s3233_s10 + $0x144] ss:$8 sps:$4 sm:$0xff]   ;;  %v2709_v35 = vld [vmem:[%s3233_s10 + $0x40] ss:$8 sps:$4 sm:$0xff]   ;;  %p2901_p13 = pnand %p2900_p9, %p2894_p3 }
  0x94   : > { %v2710_v36 = vld [vmem:[%s3233_s10 + $0x140] ss:$8 sps:$4 sm:$0xff]   ;;  %v2711_v37 = vld [vmem:[%s3233_s10 + $0x54] ss:$8 sps:$4 sm:$0xff]   ;;  %v2715_v39 = vld [vmem:[%s3233_s10 + $0x50] ss:$8 sps:$4 sm:$0xff]  }
  0x95   : > { %v2713_v38 = vld [vmem:[%s3233_s10 + $0x154] ss:$8 sps:$4 sm:$0xff]   ;;  %v2716_v40 = vld [vmem:[%s3233_s10 + $0x150] ss:$8 sps:$4 sm:$0xff]   ;;  %v2717_v41 = vld [vmem:[%s3233_s10 + $0x64] ss:$8 sps:$4 sm:$0xff]  }
  0x96   : > { %963 = vmatpush1.bf16.msra.mxu0 %v2668_v4  ;;  %2552 = vmatpush1.bf16.msra.mxu1 %v2668_v4  ;;  %v2719_v42 = vld [vmem:[%s3233_s10 + $0x164] ss:$8 sps:$4 sm:$0xff]   ;;  %v2721_v43 = vld [vmem:[%s3233_s10 + $0x60] ss:$8 sps:$4 sm:$0xff]   ;;  %v2723_v45 = vld [vmem:[%s3233_s10 + $0x74] ss:$8 sps:$4 sm:$0xff]  }
  0x97   : > { %964 = vmatprep.subr.bf16.mxu0 %v2991_v0  ;;  %2537 = vmatprep.subr.bf16.mxu1 %v2991_v0  ;;  %v2722_v44 = vld [vmem:[%s3233_s10 + $0x160] ss:$8 sps:$4 sm:$0xff]   ;;  %v2725_v46 = vld [vmem:[%s3233_s10 + $0x174] ss:$8 sps:$4 sm:$0xff]   ;;  %v2727_v47 = vld [vmem:[%s3233_s10 + $0x70] ss:$8 sps:$4 sm:$0xff]  }
  0x98   : > { %v2728_v48 = vld [vmem:[%s3233_s10 + $0x170] ss:$8 sps:$4 sm:$0xff]   ;;  %v2729_v49 = vld [vmem:[%s3233_s10 + $0x84] ss:$8 sps:$4 sm:$0xff]   ;;  %v2733_v51 = vld [vmem:[%s3233_s10 + $0x80] ss:$8 sps:$4 sm:$0xff]  }
  0x99   : > { %v2731_v50 = vld [vmem:[%s3233_s10 + $0x184] ss:$8 sps:$4 sm:$0xff]   ;;  %v2734_v52 = vld [vmem:[%s3233_s10 + $0x180] ss:$8 sps:$4 sm:$0xff]   ;;  %v2735_v53 = vld [vmem:[%s3233_s10 + $0x94] ss:$8 sps:$4 sm:$0xff]  }
  0x9a   : > { %965 = vmatpush1.bf16.msra.mxu0 %v2669_v5  ;;  %2553 = vmatpush1.bf16.msra.mxu1 %v2669_v5  ;;  %v2737_v54 = vld [vmem:[%s3233_s10 + $0x194] ss:$8 sps:$4 sm:$0xff]   ;;  %v2739_v55 = vld [vmem:[%s3233_s10 + $0x90] ss:$8 sps:$4 sm:$0xff]   ;;  %v2741_v57 = vld [vmem:[%s3233_s10 + $0xa4] ss:$8 sps:$4 sm:$0xff]  }
  0x9b   : > { %966 = vmatprep.subr.bf16.mxu0 %v2991_v0  ;;  %2538 = vmatprep.subr.bf16.mxu1 %v2991_v0  ;;  %v2740_v56 = vld [vmem:[%s3233_s10 + $0x190] ss:$8 sps:$4 sm:$0xff]   ;;  %v2743_v58 = vld [vmem:[%s3233_s10 + $0x1a4] ss:$8 sps:$4 sm:$0xff]   ;;  %v2745_v59 = vld [vmem:[%s3233_s10 + $0xa0] ss:$8 sps:$4 sm:$0xff]  }
  0x9c   : > { %v2746_v60 = vld [vmem:[%s3233_s10 + $0x1a0] ss:$8 sps:$4 sm:$0xff]   ;;  %v2747_v61 = vld [vmem:[%s3233_s10 + $0xb4] ss:$8 sps:$4 sm:$0xff]   ;;  %v2751_v63 = vld [vmem:[%s3233_s10 + $0xb0] ss:$8 sps:$4 sm:$0xff]  }
  0x9d   : > { %v2749_v62 = vld [vmem:[%s3233_s10 + $0x1b4] ss:$8 sps:$4 sm:$0xff]   ;;  %v2753_v1 = vld [vmem:[%s3233_s10 + $0xc4] ss:$8 sps:$4 sm:$0xff]   ;;  %v2757_v3 = vld [vmem:[%s3233_s10 + $0xc0] ss:$8 sps:$4 sm:$0xff]  }
  0x9e   : > { %967 = vmatpush1.bf16.msra.mxu0 %v2670_v7  ;;  %2554 = vmatpush1.bf16.msra.mxu1 %v2670_v7  ;;  %v2755_v2 = vld [vmem:[%s3233_s10 + $0x1c4] ss:$8 sps:$4 sm:$0xff]   ;;  %v2758_v4 = vld [vmem:[%s3233_s10 + $0x1c0] ss:$8 sps:$4 sm:$0xff]   ;;  %v2759_v5 = vld [vmem:[%s3233_s10 + $0xd4] ss:$8 sps:$4 sm:$0xff]  }
  0x9f   : > { %968 = vmatprep.subr.bf16.mxu0 %v2991_v0  ;;  %2539 = vmatprep.subr.bf16.mxu1 %v2991_v0  ;;  %v2761_v6 = vld [vmem:[%s3233_s10 + $0x1d4] ss:$8 sps:$4 sm:$0xff]   ;;  %v2763_v7 = vld [vmem:[%s3233_s10 + $0xd0] ss:$8 sps:$4 sm:$0xff]  }
  0xa0   : > { %v2764_v8 = vld [vmem:[%s3233_s10 + $0x1d0] ss:$8 sps:$4 sm:$0xff]  }
  0xa2   : > { %969 = vmatpush1.bf16.msra.mxu0 %v2671_v9  ;;  %2555 = vmatpush1.bf16.msra.mxu1 %v2671_v9  ;;  %v2765_v9 = vld [vmem:[%s3233_s10 + $0xe4] ss:$8 sps:$4 sm:$0xff]  }
  0xa3   : > { %970 = vmatprep.subr.bf16.mxu0 %v2991_v0  ;;  %2540 = vmatprep.subr.bf16.mxu1 %v2991_v0 }
  0xa6   : > { %971 = vmatpush1.bf16.msra.mxu0 %v2672_v10  ;;  %2556 = vmatpush1.bf16.msra.mxu1 %v2672_v10  ;;  %v2767_v10 = vld [vmem:[%s3233_s10 + $0x1e4] ss:$8 sps:$4 sm:$0xff]  }
  0xa7   : > { %972 = vmatprep.subr.bf16.mxu0 %v2991_v0  ;;  %2541 = vmatprep.subr.bf16.mxu1 %v2991_v0 }
  0xaa   : > { %973 = vmatpush1.bf16.msra.mxu0 %v2673_v11  ;;  %2557 = vmatpush1.bf16.msra.mxu1 %v2673_v11  ;;  %v2769_v11 = vld [vmem:[%s3233_s10 + $0xe0] ss:$8 sps:$4 sm:$0xff]  }
  0xab   : > { %974 = vmatprep.subr.bf16.mxu0 %v2991_v0  ;;  %2542 = vmatprep.subr.bf16.mxu1 %v2991_v0 }
  0xae   : > { %975 = vmatpush1.bf16.msra.mxu0 %v2674_v12  ;;  %2558 = vmatpush1.bf16.msra.mxu1 %v2674_v12  ;;  %v2770_v12 = vld [vmem:[%s3233_s10 + $0x1e0] ss:$8 sps:$4 sm:$0xff]  }
  0xaf   : > { %976 = vmatprep.subr.bf16.mxu0 %v2991_v0  ;;  %2543 = vmatprep.subr.bf16.mxu1 %v2991_v0 }
  0xb2   : > { %977 = vmatpush1.bf16.msra.mxu0 %v2675_v13  ;;  %2559 = vmatpush1.bf16.msra.mxu1 %v2675_v13  ;;  %v2771_v13 = vld [vmem:[%s3233_s10 + $0xf4] ss:$8 sps:$4 sm:$0xff]  }
  0xb3   : > { %978 = vmatprep.subr.bf16.mxu0 %v2991_v0  ;;  %2544 = vmatprep.subr.bf16.mxu1 %v2991_v0 }
  0xb6   : > { %979 = vmatpush1.bf16.msra.mxu0 %v2676_v14  ;;  %2560 = vmatpush1.bf16.msra.mxu1 %v2676_v14  ;;  %v2773_v14 = vld [vmem:[%s3233_s10 + $0x1f4] ss:$8 sps:$4 sm:$0xff]  }
  0xb7   : > { %980 = vmatprep.subr.bf16.mxu0 %v2991_v0  ;;  %2545 = vmatprep.subr.bf16.mxu1 %v2991_v0 }
  0xba   : > { %981 = vmatpush1.bf16.msra.mxu0 %v2677_v15  ;;  %2561 = vmatpush1.bf16.msra.mxu1 %v2677_v15  ;;  %v2775_v15 = vld [vmem:[%s3233_s10 + $0xf0] ss:$8 sps:$4 sm:$0xff]  }
  0xbb   : > { %982 = vmatprep.subr.bf16.mxu0 %v2991_v0  ;;  %2546 = vmatprep.subr.bf16.mxu1 %v2991_v0 }
  0xbe   : > { %983 = vmatpush1.bf16.msra.mxu0 %v2678_v16  ;;  %2562 = vmatpush1.bf16.msra.mxu1 %v2678_v16  ;;  %v2776_v16 = vld [vmem:[%s3233_s10 + $0x1f0] ss:$8 sps:$4 sm:$0xff]  }
  0xbf   : > { %984 = vmatprep.subr.bf16.mxu0 %v2991_v0  ;;  %2547 = vmatprep.subr.bf16.mxu1 %v2991_v0 }
  0xc2   : > { %985 = vmatpush1.bf16.msra.mxu0 %v2679_v17  ;;  %2563 = vmatpush1.bf16.msra.mxu1 %v2679_v17  ;;  %v3343_v17 = vld [vmem:[#allocation8] ss:$0 sm:$0xff] }
  0xc3   : > { %986 = vmatprep.subr.bf16.mxu0 %v2991_v0  ;;  %2548 = vmatprep.subr.bf16.mxu1 %v2991_v0  ;;  %v2752_v0 = vld [vmem:[%s3233_s10 + $0x1b0] ss:$8 sps:$4 sm:$0xff]  }
  0xc6   : > { %987 = vmatpush1.bf16.msra.mxu0 %v2680_v18  ;;  %2564 = vmatpush1.bf16.msra.mxu1 %v2680_v18 }
  0xc9   : > { %989 = vmatmul.mubr.bf16.vlgmr.msra.gmra.mrb[0].mxu0 %v2681_v19  ;;  %1117 = vmatmul.mubr.bf16.vlgmr.msra.gmra.mrb[0].mxu1 %v2684_v20  ;;  %v3345_v19 = vld [vmem:[#allocation9] ss:$0 sm:$0xff] }
  0xca   : > { %996 = vmatprep.mubr.bf16.mxu0 %v2687_v21  ;;  %1124 = vmatprep.mubr.bf16.mxu1 %v2689_v22 }
  0xd1   : > { %997 = vmatmul.mubr.bf16.gmra.mrb[4].mxu0 %v2691_v23  ;;  %1125 = vmatmul.mubr.bf16.gmra.mrb[4].mxu1 %v2692_v24 }
  0xd2   : > { %1004 = vmatprep.mubr.bf16.mxu0 %v2693_v25  ;;  %1132 = vmatprep.mubr.bf16.mxu1 %v2695_v26 }
  0xd9   : > { %1005 = vmatmul.mubr.bf16.gmra.mrb[8].mxu0 %v2697_v27  ;;  %1133 = vmatmul.mubr.bf16.gmra.mrb[8].mxu1 %v2698_v28 }
  0xda   : > { %1012 = vmatprep.mubr.bf16.mxu0 %v2699_v29  ;;  %1140 = vmatprep.mubr.bf16.mxu1 %v2701_v30 }
  0xe1   : > { %1013 = vmatmul.mubr.bf16.gmra.mrb[12].mxu0 %v2703_v31  ;;  %1141 = vmatmul.mubr.bf16.gmra.mrb[12].mxu1 %v2704_v32 }
  0xe2   : > { %1020 = vmatprep.mubr.bf16.mxu0 %v2705_v33  ;;  %1148 = vmatprep.mubr.bf16.mxu1 %v2707_v34 }
  0xe9   : > { %1021 = vmatmul.mubr.bf16.gmra.mrb[16].mxu0 %v2709_v35  ;;  %1149 = vmatmul.mubr.bf16.gmra.mrb[16].mxu1 %v2710_v36 }
  0xea   : > { %1028 = vmatprep.mubr.bf16.mxu0 %v2711_v37  ;;  %1156 = vmatprep.mubr.bf16.mxu1 %v2713_v38 }
  0xf1   : > { %1029 = vmatmul.mubr.bf16.gmra.mrb[20].mxu0 %v2715_v39  ;;  %1157 = vmatmul.mubr.bf16.gmra.mrb[20].mxu1 %v2716_v40 }
  0xf2   : > { %1036 = vmatprep.mubr.bf16.mxu0 %v2717_v41  ;;  %1164 = vmatprep.mubr.bf16.mxu1 %v2719_v42 }
  0xf9   : > { %1037 = vmatmul.mubr.bf16.gmra.mrb[24].mxu0 %v2721_v43  ;;  %1165 = vmatmul.mubr.bf16.gmra.mrb[24].mxu1 %v2722_v44 }
  0xfa   : > { %1044 = vmatprep.mubr.bf16.mxu0 %v2723_v45  ;;  %1172 = vmatprep.mubr.bf16.mxu1 %v2725_v46 }
 0x101   : > { %1045 = vmatmul.mubr.bf16.gmra.mrb[28].mxu0 %v2727_v47  ;;  %1173 = vmatmul.mubr.bf16.gmra.mrb[28].mxu1 %v2728_v48 }
 0x102   : > { %1052 = vmatprep.mubr.bf16.mxu0 %v2729_v49  ;;  %1180 = vmatprep.mubr.bf16.mxu1 %v2731_v50 }
 0x109   : > { %1053 = vmatmul.mubr.bf16.gmra.mrb[32].mxu0 %v2733_v51  ;;  %1181 = vmatmul.mubr.bf16.gmra.mrb[32].mxu1 %v2734_v52 }
 0x10a   : > { %1060 = vmatprep.mubr.bf16.mxu0 %v2735_v53  ;;  %1188 = vmatprep.mubr.bf16.mxu1 %v2737_v54 }
 0x111   : > { %1061 = vmatmul.mubr.bf16.gmra.mrb[36].mxu0 %v2739_v55  ;;  %1189 = vmatmul.mubr.bf16.gmra.mrb[36].mxu1 %v2740_v56 }
 0x112   : > { %1068 = vmatprep.mubr.bf16.mxu0 %v2741_v57  ;;  %1196 = vmatprep.mubr.bf16.mxu1 %v2743_v58 }
 0x119   : > { %1069 = vmatmul.mubr.bf16.gmra.mrb[40].mxu0 %v2745_v59  ;;  %1197 = vmatmul.mubr.bf16.gmra.mrb[40].mxu1 %v2746_v60 }
 0x11a   : > { %1076 = vmatprep.mubr.bf16.mxu0 %v2747_v61  ;;  %1204 = vmatprep.mubr.bf16.mxu1 %v2749_v62 }
 0x121   : > { %1077 = vmatmul.mubr.bf16.gmra.mrb[44].mxu0 %v2751_v63  ;;  %1205 = vmatmul.mubr.bf16.gmra.mrb[44].mxu1 %v2752_v0 }
 0x122   : > { %1084 = vmatprep.mubr.bf16.mxu0 %v2753_v1  ;;  %1212 = vmatprep.mubr.bf16.mxu1 %v2755_v2 }
 0x129   : > { %1085 = vmatmul.mubr.bf16.gmra.mrb[48].mxu0 %v2757_v3  ;;  %1213 = vmatmul.mubr.bf16.gmra.mrb[48].mxu1 %v2758_v4 }
 0x12a   : > { %1092 = vmatprep.mubr.bf16.mxu0 %v2759_v5  ;;  %1220 = vmatprep.mubr.bf16.mxu1 %v2761_v6 }
 0x131   : > { %1093 = vmatmul.mubr.bf16.gmra.mrb[52].mxu0 %v2763_v7  ;;  %1221 = vmatmul.mubr.bf16.gmra.mrb[52].mxu1 %v2764_v8 }
 0x132   : > { %1100 = vmatprep.mubr.bf16.mxu0 %v2765_v9  ;;  %1228 = vmatprep.mubr.bf16.mxu1 %v2767_v10 }
 0x139   : > { %1101 = vmatmul.mubr.bf16.gmra.mrb[56].mxu0 %v2769_v11  ;;  %1229 = vmatmul.mubr.bf16.gmra.mrb[56].mxu1 %v2770_v12 }
 0x13a   : > { %1108 = vmatprep.mubr.bf16.mxu0 %v2771_v13  ;;  %1236 = vmatprep.mubr.bf16.mxu1 %v2773_v14 }
 0x141   : > { %1109 = vmatmul.mubr.bf16.gmra.mrb[60].mxu0 %v2775_v15  ;;  %1237 = vmatmul.mubr.bf16.gmra.mrb[60].mxu1 %v2776_v16 }
 0x19c   : > { %v990_v18 = vpop.f32.mrb[0].mxu0  ;;  %v1118_v20 = vpop.f32.mrb[0].mxu1 }
 0x19d   : > { %v1447_v21 = vmul.f32 %v3343_v17, %v990_v18  ;;  %v1479_v22 = vmul.f32 %v3343_v17, %v1118_v20  ;;  %v992_v23 = vpop.f32.mrb[1].mxu0  ;;  %v1120_v24 = vpop.f32.mrb[1].mxu1 }
 0x19e   : > { %v993_v25 = vpop.f32.mrb[2].mxu0  ;;  %v1121_v26 = vpop.f32.mrb[2].mxu1 }
 0x19f   : > { %v1518_v27 = vadd.f32 %v3345_v19, %v1447_v21  ;;  %v1550_v28 = vadd.f32 %v3345_v19, %v1479_v22  ;;  %v1448_v29 = vmul.f32 %v3343_v17, %v993_v25  ;;  %v1480_v30 = vmul.f32 %v3343_v17, %v1121_v26  ;;  %v995_v31 = vpop.f32.mrb[3].mxu0  ;;  %v1123_v32 = vpop.f32.mrb[3].mxu1 }
 0x1a1   : > { %v1519_v33 = vadd.f32 %v3345_v19, %v1448_v29  ;;  %v1551_v34 = vadd.f32 %v3345_v19, %v1480_v30  ;;  %v1582_v35 = vmax.f32 %v1518_v27, 0.0  ;;  %v1614_v36 = vmax.f32 %v1550_v28, 0.0 }
 0x1a3   : > { %v1583_v37 = vmax.f32 %v1519_v33, 0.0  ;;  %v1615_v38 = vmax.f32 %v1551_v34, 0.0 }
 0x1a4   : > { %v998_v39 = vpop.f32.mrb[4].mxu0  ;;  %v1126_v40 = vpop.f32.mrb[4].mxu1 }
 0x1a5   : > { %v2345_v41 = vpack.c.bf16 %v1583_v37, %v1582_v35  ;;  %v2425_v42 = vpack.c.bf16 %v1615_v38, %v1614_v36  ;;  %v1449_v43 = vmul.f32 %v3343_v17, %v998_v39  ;;  %v1481_v44 = vmul.f32 %v3343_v17, %v1126_v40  ;;  %v1000_v45 = vpop.f32.mrb[5].mxu0  ;;  %v1128_v46 = vpop.f32.mrb[5].mxu1 }
 0x1a6   : > { %v1001_v47 = vpop.f32.mrb[6].mxu0  ;;  %v1129_v48 = vpop.f32.mrb[6].mxu1 }
 0x1a7   : > { %2346 = vst [vmem:[%s3358_s25] sm:$0xff] %v2345_v41   ;;  %2517 = vst [vmem:[%s3358_s25 + $0x80] sm:$0xff] %v2425_v42   ;;  %v1520_v49 = vadd.f32 %v3345_v19, %v1449_v43  ;;  %v1552_v50 = vadd.f32 %v3345_v19, %v1481_v44  ;;  %v1450_v51 = vmul.f32 %v3343_v17, %v1001_v47  ;;  %v1003_v53 = vpop.f32.mrb[7].mxu0  ;;  %v1131_v54 = vpop.f32.mrb[7].mxu1 }
 0x1a8   : > { %v1482_v52 = vmul.f32 %v3343_v17, %v1129_v48 }
 0x1a9   : > { %v1521_v55 = vadd.f32 %v3345_v19, %v1450_v51  ;;  %v1584_v57 = vmax.f32 %v1520_v49, 0.0  ;;  %v1616_v58 = vmax.f32 %v1552_v50, 0.0 }
 0x1aa   : > { %v1553_v56 = vadd.f32 %v3345_v19, %v1482_v52 }
 0x1ab   : > { %v1585_v59 = vmax.f32 %v1521_v55, 0.0 }
 0x1ac   : > { %v1617_v60 = vmax.f32 %v1553_v56, 0.0  ;;  %v1006_v61 = vpop.f32.mrb[8].mxu0  ;;  %v1134_v62 = vpop.f32.mrb[8].mxu1 }
 0x1ad   : > { %v2350_v63 = vpack.c.bf16 %v1585_v59, %v1584_v57  ;;  %v1451_v1 = vmul.f32 %v3343_v17, %v1006_v61  ;;  %v1483_v2 = vmul.f32 %v3343_v17, %v1134_v62  ;;  %v1008_v3 = vpop.f32.mrb[9].mxu0  ;;  %v1136_v4 = vpop.f32.mrb[9].mxu1 }
 0x1ae   : > { %v2430_v0 = vpack.c.bf16 %v1617_v60, %v1616_v58  ;;  %v1009_v5 = vpop.f32.mrb[10].mxu0  ;;  %v1137_v6 = vpop.f32.mrb[10].mxu1 }
 0x1af   : > { %2502 = vst [vmem:[%s3358_s25 + $0x8] sm:$0xff] %v2350_v63   ;;  %v1522_v7 = vadd.f32 %v3345_v19, %v1451_v1  ;;  %v1554_v8 = vadd.f32 %v3345_v19, %v1483_v2  ;;  %v1452_v9 = vmul.f32 %v3343_v17, %v1009_v5  ;;  %v1484_v10 = vmul.f32 %v3343_v17, %v1137_v6  ;;  %v1011_v11 = vpop.f32.mrb[11].mxu0  ;;  %v1139_v12 = vpop.f32.mrb[11].mxu1 }
 0x1b0   : > { %2518 = vst [vmem:[%s3358_s25 + $0x88] sm:$0xff] %v2430_v0  }
 0x1b1   : > { %v1523_v13 = vadd.f32 %v3345_v19, %v1452_v9  ;;  %v1555_v14 = vadd.f32 %v3345_v19, %v1484_v10  ;;  %v1586_v15 = vmax.f32 %v1522_v7, 0.0  ;;  %v1618_v16 = vmax.f32 %v1554_v8, 0.0 }
 0x1b3   : > { %v1587_v18 = vmax.f32 %v1523_v13, 0.0  ;;  %v1619_v20 = vmax.f32 %v1555_v14, 0.0 }
 0x1b4   : > { %v1014_v21 = vpop.f32.mrb[12].mxu0  ;;  %v1142_v22 = vpop.f32.mrb[12].mxu1 }
 0x1b5   : > { %v2355_v23 = vpack.c.bf16 %v1587_v18, %v1586_v15  ;;  %v2435_v24 = vpack.c.bf16 %v1619_v20, %v1618_v16  ;;  %v1453_v25 = vmul.f32 %v3343_v17, %v1014_v21  ;;  %v1485_v26 = vmul.f32 %v3343_v17, %v1142_v22  ;;  %v1016_v27 = vpop.f32.mrb[13].mxu0  ;;  %v1144_v28 = vpop.f32.mrb[13].mxu1 }
 0x1b6   : > { %v1017_v29 = vpop.f32.mrb[14].mxu0  ;;  %v1145_v30 = vpop.f32.mrb[14].mxu1 }
 0x1b7   : > { %2503 = vst [vmem:[%s3358_s25 + $0x10] sm:$0xff] %v2355_v23   ;;  %2519 = vst [vmem:[%s3358_s25 + $0x90] sm:$0xff] %v2435_v24   ;;  %v1524_v31 = vadd.f32 %v3345_v19, %v1453_v25  ;;  %v1556_v32 = vadd.f32 %v3345_v19, %v1485_v26  ;;  %v1454_v33 = vmul.f32 %v3343_v17, %v1017_v29  ;;  %v1019_v35 = vpop.f32.mrb[15].mxu0  ;;  %v1147_v36 = vpop.f32.mrb[15].mxu1 }
 0x1b8   : > { %v1486_v34 = vmul.f32 %v3343_v17, %v1145_v30 }
 0x1b9   : > { %v1525_v37 = vadd.f32 %v3345_v19, %v1454_v33  ;;  %v1588_v39 = vmax.f32 %v1524_v31, 0.0  ;;  %v1620_v40 = vmax.f32 %v1556_v32, 0.0 }
 0x1ba   : > { %v1557_v38 = vadd.f32 %v3345_v19, %v1486_v34 }
 0x1bb   : > { %v1589_v41 = vmax.f32 %v1525_v37, 0.0 }
 0x1bc   : > { %v1621_v42 = vmax.f32 %v1557_v38, 0.0  ;;  %v1022_v43 = vpop.f32.mrb[16].mxu0  ;;  %v1150_v44 = vpop.f32.mrb[16].mxu1 }
 0x1bd   : > { %v2360_v45 = vpack.c.bf16 %v1589_v41, %v1588_v39  ;;  %v1455_v47 = vmul.f32 %v3343_v17, %v1022_v43  ;;  %v1487_v48 = vmul.f32 %v3343_v17, %v1150_v44  ;;  %v1024_v49 = vpop.f32.mrb[17].mxu0  ;;  %v1152_v50 = vpop.f32.mrb[17].mxu1 }
 0x1be   : > { %v2440_v46 = vpack.c.bf16 %v1621_v42, %v1620_v40  ;;  %v1025_v51 = vpop.f32.mrb[18].mxu0  ;;  %v1153_v52 = vpop.f32.mrb[18].mxu1 }
 0x1bf   : > { %2504 = vst [vmem:[%s3358_s25 + $0x18] sm:$0xff] %v2360_v45   ;;  %v1526_v53 = vadd.f32 %v3345_v19, %v1455_v47  ;;  %v1558_v54 = vadd.f32 %v3345_v19, %v1487_v48  ;;  %v1456_v55 = vmul.f32 %v3343_v17, %v1025_v51  ;;  %v1488_v56 = vmul.f32 %v3343_v17, %v1153_v52  ;;  %v1027_v57 = vpop.f32.mrb[19].mxu0  ;;  %v1155_v58 = vpop.f32.mrb[19].mxu1 }
 0x1c0   : > { %2520 = vst [vmem:[%s3358_s25 + $0x98] sm:$0xff] %v2440_v46  }
 0x1c1   : > { %v1527_v59 = vadd.f32 %v3345_v19, %v1456_v55  ;;  %v1559_v60 = vadd.f32 %v3345_v19, %v1488_v56  ;;  %v1590_v61 = vmax.f32 %v1526_v53, 0.0  ;;  %v1622_v62 = vmax.f32 %v1558_v54, 0.0 }
 0x1c3   : > { %v1591_v63 = vmax.f32 %v1527_v59, 0.0  ;;  %v1623_v0 = vmax.f32 %v1559_v60, 0.0 }
 0x1c4   : > { %v1030_v1 = vpop.f32.mrb[20].mxu0  ;;  %v1158_v2 = vpop.f32.mrb[20].mxu1 }
 0x1c5   : > { %v2365_v3 = vpack.c.bf16 %v1591_v63, %v1590_v61  ;;  %v2445_v4 = vpack.c.bf16 %v1623_v0, %v1622_v62  ;;  %v1457_v5 = vmul.f32 %v3343_v17, %v1030_v1  ;;  %v1489_v6 = vmul.f32 %v3343_v17, %v1158_v2  ;;  %v1032_v7 = vpop.f32.mrb[21].mxu0  ;;  %v1160_v8 = vpop.f32.mrb[21].mxu1 }
 0x1c6   : > { %v1033_v9 = vpop.f32.mrb[22].mxu0  ;;  %v1161_v10 = vpop.f32.mrb[22].mxu1 }
 0x1c7   : > { %2505 = vst [vmem:[%s3358_s25 + $0x20] sm:$0xff] %v2365_v3   ;;  %2521 = vst [vmem:[%s3358_s25 + $0xa0] sm:$0xff] %v2445_v4   ;;  %v1528_v11 = vadd.f32 %v3345_v19, %v1457_v5  ;;  %v1560_v12 = vadd.f32 %v3345_v19, %v1489_v6  ;;  %v1458_v13 = vmul.f32 %v3343_v17, %v1033_v9  ;;  %v1035_v15 = vpop.f32.mrb[23].mxu0  ;;  %v1163_v16 = vpop.f32.mrb[23].mxu1 }
 0x1c8   : > { %v1490_v14 = vmul.f32 %v3343_v17, %v1161_v10 }
 0x1c9   : > { %v1529_v18 = vadd.f32 %v3345_v19, %v1458_v13  ;;  %v1592_v21 = vmax.f32 %v1528_v11, 0.0  ;;  %v1624_v22 = vmax.f32 %v1560_v12, 0.0 }
 0x1ca   : > { %v1561_v20 = vadd.f32 %v3345_v19, %v1490_v14 }
 0x1cb   : > { %v1593_v23 = vmax.f32 %v1529_v18, 0.0 }
 0x1cc   : > { %v1625_v24 = vmax.f32 %v1561_v20, 0.0  ;;  %v1038_v25 = vpop.f32.mrb[24].mxu0  ;;  %v1166_v26 = vpop.f32.mrb[24].mxu1 }
 0x1cd   : > { %v2370_v27 = vpack.c.bf16 %v1593_v23, %v1592_v21  ;;  %v1459_v29 = vmul.f32 %v3343_v17, %v1038_v25  ;;  %v1491_v30 = vmul.f32 %v3343_v17, %v1166_v26  ;;  %v1040_v31 = vpop.f32.mrb[25].mxu0  ;;  %v1168_v32 = vpop.f32.mrb[25].mxu1 }
 0x1ce   : > { %v2450_v28 = vpack.c.bf16 %v1625_v24, %v1624_v22  ;;  %v1041_v33 = vpop.f32.mrb[26].mxu0  ;;  %v1169_v34 = vpop.f32.mrb[26].mxu1 }
 0x1cf   : > { %2506 = vst [vmem:[%s3358_s25 + $0x28] sm:$0xff] %v2370_v27   ;;  %v1530_v35 = vadd.f32 %v3345_v19, %v1459_v29  ;;  %v1562_v36 = vadd.f32 %v3345_v19, %v1491_v30  ;;  %v1460_v37 = vmul.f32 %v3343_v17, %v1041_v33  ;;  %v1492_v38 = vmul.f32 %v3343_v17, %v1169_v34  ;;  %v1043_v39 = vpop.f32.mrb[27].mxu0  ;;  %v1171_v40 = vpop.f32.mrb[27].mxu1 }
 0x1d0   : > { %2522 = vst [vmem:[%s3358_s25 + $0xa8] sm:$0xff] %v2450_v28  }
 0x1d1   : > { %v1531_v41 = vadd.f32 %v3345_v19, %v1460_v37  ;;  %v1563_v42 = vadd.f32 %v3345_v19, %v1492_v38  ;;  %v1594_v43 = vmax.f32 %v1530_v35, 0.0  ;;  %v1626_v44 = vmax.f32 %v1562_v36, 0.0 }
 0x1d3   : > { %v1595_v45 = vmax.f32 %v1531_v41, 0.0  ;;  %v1627_v46 = vmax.f32 %v1563_v42, 0.0 }
 0x1d4   : > { %v1046_v47 = vpop.f32.mrb[28].mxu0  ;;  %v1174_v48 = vpop.f32.mrb[28].mxu1 }
 0x1d5   : > { %v2375_v49 = vpack.c.bf16 %v1595_v45, %v1594_v43  ;;  %v2455_v50 = vpack.c.bf16 %v1627_v46, %v1626_v44  ;;  %v1461_v51 = vmul.f32 %v3343_v17, %v1046_v47  ;;  %v1493_v52 = vmul.f32 %v3343_v17, %v1174_v48  ;;  %v1048_v53 = vpop.f32.mrb[29].mxu0  ;;  %v1176_v54 = vpop.f32.mrb[29].mxu1 }
 0x1d6   : > { %v1049_v55 = vpop.f32.mrb[30].mxu0  ;;  %v1177_v56 = vpop.f32.mrb[30].mxu1 }
 0x1d7   : > { %2507 = vst [vmem:[%s3358_s25 + $0x30] sm:$0xff] %v2375_v49   ;;  %2523 = vst [vmem:[%s3358_s25 + $0xb0] sm:$0xff] %v2455_v50   ;;  %v1532_v57 = vadd.f32 %v3345_v19, %v1461_v51  ;;  %v1564_v58 = vadd.f32 %v3345_v19, %v1493_v52  ;;  %v1462_v59 = vmul.f32 %v3343_v17, %v1049_v55  ;;  %v1051_v61 = vpop.f32.mrb[31].mxu0  ;;  %v1179_v62 = vpop.f32.mrb[31].mxu1 }
 0x1d8   : > { %v1494_v60 = vmul.f32 %v3343_v17, %v1177_v56 }
 0x1d9   : > { %v1533_v63 = vadd.f32 %v3345_v19, %v1462_v59  ;;  %v1596_v1 = vmax.f32 %v1532_v57, 0.0  ;;  %v1628_v2 = vmax.f32 %v1564_v58, 0.0 }
 0x1da   : > { %v1565_v0 = vadd.f32 %v3345_v19, %v1494_v60 }
 0x1db   : > { %v1597_v3 = vmax.f32 %v1533_v63, 0.0 }
 0x1dc   : > { %v1629_v4 = vmax.f32 %v1565_v0, 0.0  ;;  %v1054_v5 = vpop.f32.mrb[32].mxu0  ;;  %v1182_v6 = vpop.f32.mrb[32].mxu1 }
 0x1dd   : > { %v2380_v7 = vpack.c.bf16 %v1597_v3, %v1596_v1  ;;  %v1463_v9 = vmul.f32 %v3343_v17, %v1054_v5  ;;  %v1495_v10 = vmul.f32 %v3343_v17, %v1182_v6  ;;  %v1056_v11 = vpop.f32.mrb[33].mxu0  ;;  %v1184_v12 = vpop.f32.mrb[33].mxu1 }
 0x1de   : > { %v2460_v8 = vpack.c.bf16 %v1629_v4, %v1628_v2  ;;  %v1057_v13 = vpop.f32.mrb[34].mxu0  ;;  %v1185_v14 = vpop.f32.mrb[34].mxu1 }
 0x1df   : > { %2508 = vst [vmem:[%s3358_s25 + $0x38] sm:$0xff] %v2380_v7   ;;  %v1534_v15 = vadd.f32 %v3345_v19, %v1463_v9  ;;  %v1566_v16 = vadd.f32 %v3345_v19, %v1495_v10  ;;  %v1464_v18 = vmul.f32 %v3343_v17, %v1057_v13  ;;  %v1496_v20 = vmul.f32 %v3343_v17, %v1185_v14  ;;  %v1059_v21 = vpop.f32.mrb[35].mxu0  ;;  %v1187_v22 = vpop.f32.mrb[35].mxu1 }
 0x1e0   : > { %2524 = vst [vmem:[%s3358_s25 + $0xb8] sm:$0xff] %v2460_v8  }
 0x1e1   : > { %v1535_v23 = vadd.f32 %v3345_v19, %v1464_v18  ;;  %v1567_v24 = vadd.f32 %v3345_v19, %v1496_v20  ;;  %v1598_v25 = vmax.f32 %v1534_v15, 0.0  ;;  %v1630_v26 = vmax.f32 %v1566_v16, 0.0 }
 0x1e3   : > { %v1599_v27 = vmax.f32 %v1535_v23, 0.0  ;;  %v1631_v28 = vmax.f32 %v1567_v24, 0.0 }
 0x1e4   : > { %v1062_v29 = vpop.f32.mrb[36].mxu0  ;;  %v1190_v30 = vpop.f32.mrb[36].mxu1 }
 0x1e5   : > { %v2385_v31 = vpack.c.bf16 %v1599_v27, %v1598_v25  ;;  %v2465_v32 = vpack.c.bf16 %v1631_v28, %v1630_v26  ;;  %v1465_v33 = vmul.f32 %v3343_v17, %v1062_v29  ;;  %v1497_v34 = vmul.f32 %v3343_v17, %v1190_v30  ;;  %v1064_v35 = vpop.f32.mrb[37].mxu0  ;;  %v1192_v36 = vpop.f32.mrb[37].mxu1 }
 0x1e6   : > { %v1065_v37 = vpop.f32.mrb[38].mxu0  ;;  %v1193_v38 = vpop.f32.mrb[38].mxu1 }
 0x1e7   : > { %2509 = vst [vmem:[%s3358_s25 + $0x40] sm:$0xff] %v2385_v31   ;;  %2525 = vst [vmem:[%s3358_s25 + $0xc0] sm:$0xff] %v2465_v32   ;;  %v1536_v39 = vadd.f32 %v3345_v19, %v1465_v33  ;;  %v1568_v40 = vadd.f32 %v3345_v19, %v1497_v34  ;;  %v1466_v41 = vmul.f32 %v3343_v17, %v1065_v37  ;;  %v1067_v43 = vpop.f32.mrb[39].mxu0  ;;  %v1195_v44 = vpop.f32.mrb[39].mxu1 }
 0x1e8   : > { %v1498_v42 = vmul.f32 %v3343_v17, %v1193_v38 }
 0x1e9   : > { %v1537_v45 = vadd.f32 %v3345_v19, %v1466_v41  ;;  %v1600_v47 = vmax.f32 %v1536_v39, 0.0  ;;  %v1632_v48 = vmax.f32 %v1568_v40, 0.0 }
 0x1ea   : > { %v1569_v46 = vadd.f32 %v3345_v19, %v1498_v42 }
 0x1eb   : > { %v1601_v49 = vmax.f32 %v1537_v45, 0.0 }
 0x1ec   : > { %v1633_v50 = vmax.f32 %v1569_v46, 0.0  ;;  %v1070_v51 = vpop.f32.mrb[40].mxu0  ;;  %v1198_v52 = vpop.f32.mrb[40].mxu1 }
 0x1ed   : > { %v2390_v53 = vpack.c.bf16 %v1601_v49, %v1600_v47  ;;  %v1467_v55 = vmul.f32 %v3343_v17, %v1070_v51  ;;  %v1499_v56 = vmul.f32 %v3343_v17, %v1198_v52  ;;  %v1072_v57 = vpop.f32.mrb[41].mxu0  ;;  %v1200_v58 = vpop.f32.mrb[41].mxu1 }
 0x1ee   : > { %v2470_v54 = vpack.c.bf16 %v1633_v50, %v1632_v48  ;;  %v1073_v59 = vpop.f32.mrb[42].mxu0  ;;  %v1201_v60 = vpop.f32.mrb[42].mxu1 }
 0x1ef   : > { %2510 = vst [vmem:[%s3358_s25 + $0x48] sm:$0xff] %v2390_v53   ;;  %v1538_v61 = vadd.f32 %v3345_v19, %v1467_v55  ;;  %v1570_v62 = vadd.f32 %v3345_v19, %v1499_v56  ;;  %v1468_v63 = vmul.f32 %v3343_v17, %v1073_v59  ;;  %v1500_v0 = vmul.f32 %v3343_v17, %v1201_v60  ;;  %v1075_v1 = vpop.f32.mrb[43].mxu0  ;;  %v1203_v2 = vpop.f32.mrb[43].mxu1 }
 0x1f0   : > { %2526 = vst [vmem:[%s3358_s25 + $0xc8] sm:$0xff] %v2470_v54  }
 0x1f1   : > { %v1539_v3 = vadd.f32 %v3345_v19, %v1468_v63  ;;  %v1571_v4 = vadd.f32 %v3345_v19, %v1500_v0  ;;  %v1602_v5 = vmax.f32 %v1538_v61, 0.0  ;;  %v1634_v6 = vmax.f32 %v1570_v62, 0.0 }
 0x1f3   : > { %v1603_v7 = vmax.f32 %v1539_v3, 0.0  ;;  %v1635_v8 = vmax.f32 %v1571_v4, 0.0 }
 0x1f4   : > { %v1078_v9 = vpop.f32.mrb[44].mxu0  ;;  %v1206_v10 = vpop.f32.mrb[44].mxu1 }
 0x1f5   : > { %v2395_v11 = vpack.c.bf16 %v1603_v7, %v1602_v5  ;;  %v2475_v12 = vpack.c.bf16 %v1635_v8, %v1634_v6  ;;  %v1469_v13 = vmul.f32 %v3343_v17, %v1078_v9  ;;  %v1501_v14 = vmul.f32 %v3343_v17, %v1206_v10  ;;  %v1080_v15 = vpop.f32.mrb[45].mxu0  ;;  %v1208_v16 = vpop.f32.mrb[45].mxu1 }
 0x1f6   : > { %v1081_v18 = vpop.f32.mrb[46].mxu0  ;;  %v1209_v20 = vpop.f32.mrb[46].mxu1 }
 0x1f7   : > { %2511 = vst [vmem:[%s3358_s25 + $0x50] sm:$0xff] %v2395_v11   ;;  %2527 = vst [vmem:[%s3358_s25 + $0xd0] sm:$0xff] %v2475_v12   ;;  %v1540_v21 = vadd.f32 %v3345_v19, %v1469_v13  ;;  %v1572_v22 = vadd.f32 %v3345_v19, %v1501_v14  ;;  %v1470_v23 = vmul.f32 %v3343_v17, %v1081_v18  ;;  %v1083_v25 = vpop.f32.mrb[47].mxu0  ;;  %v1211_v26 = vpop.f32.mrb[47].mxu1 }
 0x1f8   : > { %v1502_v24 = vmul.f32 %v3343_v17, %v1209_v20 }
 0x1f9   : > { %v1541_v27 = vadd.f32 %v3345_v19, %v1470_v23  ;;  %v1604_v29 = vmax.f32 %v1540_v21, 0.0  ;;  %v1636_v30 = vmax.f32 %v1572_v22, 0.0 }
 0x1fa   : > { %v1573_v28 = vadd.f32 %v3345_v19, %v1502_v24 }
 0x1fb   : > { %v1605_v31 = vmax.f32 %v1541_v27, 0.0 }
 0x1fc   : > { %v1637_v32 = vmax.f32 %v1573_v28, 0.0  ;;  %v1086_v33 = vpop.f32.mrb[48].mxu0  ;;  %v1214_v34 = vpop.f32.mrb[48].mxu1 }
 0x1fd   : > { %v2400_v35 = vpack.c.bf16 %v1605_v31, %v1604_v29  ;;  %v1471_v37 = vmul.f32 %v3343_v17, %v1086_v33  ;;  %v1503_v38 = vmul.f32 %v3343_v17, %v1214_v34  ;;  %v1088_v39 = vpop.f32.mrb[49].mxu0  ;;  %v1216_v40 = vpop.f32.mrb[49].mxu1 }
 0x1fe   : > { %v2480_v36 = vpack.c.bf16 %v1637_v32, %v1636_v30  ;;  %v1089_v41 = vpop.f32.mrb[50].mxu0  ;;  %v1217_v42 = vpop.f32.mrb[50].mxu1 }
 0x1ff   : > { %2512 = vst [vmem:[%s3358_s25 + $0x58] sm:$0xff] %v2400_v35   ;;  %v1542_v43 = vadd.f32 %v3345_v19, %v1471_v37  ;;  %v1574_v44 = vadd.f32 %v3345_v19, %v1503_v38  ;;  %v1472_v45 = vmul.f32 %v3343_v17, %v1089_v41  ;;  %v1504_v46 = vmul.f32 %v3343_v17, %v1217_v42  ;;  %v1091_v47 = vpop.f32.mrb[51].mxu0  ;;  %v1219_v48 = vpop.f32.mrb[51].mxu1 }
 0x200   : > { %2528 = vst [vmem:[%s3358_s25 + $0xd8] sm:$0xff] %v2480_v36  }
 0x201   : > { %v1543_v49 = vadd.f32 %v3345_v19, %v1472_v45  ;;  %v1575_v50 = vadd.f32 %v3345_v19, %v1504_v46  ;;  %v1606_v51 = vmax.f32 %v1542_v43, 0.0  ;;  %v1638_v52 = vmax.f32 %v1574_v44, 0.0 }
 0x203   : > { %v1607_v53 = vmax.f32 %v1543_v49, 0.0  ;;  %v1639_v54 = vmax.f32 %v1575_v50, 0.0 }
 0x204   : > { %v1094_v55 = vpop.f32.mrb[52].mxu0  ;;  %v1222_v56 = vpop.f32.mrb[52].mxu1 }
 0x205   : > { %v2405_v57 = vpack.c.bf16 %v1607_v53, %v1606_v51  ;;  %v2485_v58 = vpack.c.bf16 %v1639_v54, %v1638_v52  ;;  %v1473_v59 = vmul.f32 %v3343_v17, %v1094_v55  ;;  %v1505_v60 = vmul.f32 %v3343_v17, %v1222_v56  ;;  %v1096_v61 = vpop.f32.mrb[53].mxu0  ;;  %v1224_v62 = vpop.f32.mrb[53].mxu1 }
 0x206   : > { %v1097_v63 = vpop.f32.mrb[54].mxu0  ;;  %v1225_v0 = vpop.f32.mrb[54].mxu1 }
 0x207   : > { %2513 = vst [vmem:[%s3358_s25 + $0x60] sm:$0xff] %v2405_v57   ;;  %2529 = vst [vmem:[%s3358_s25 + $0xe0] sm:$0xff] %v2485_v58   ;;  %v1544_v1 = vadd.f32 %v3345_v19, %v1473_v59  ;;  %v1576_v2 = vadd.f32 %v3345_v19, %v1505_v60  ;;  %v1474_v3 = vmul.f32 %v3343_v17, %v1097_v63  ;;  %v1099_v5 = vpop.f32.mrb[55].mxu0  ;;  %v1227_v6 = vpop.f32.mrb[55].mxu1 }
 0x208   : > { %v1506_v4 = vmul.f32 %v3343_v17, %v1225_v0 }
 0x209   : > { %v1545_v7 = vadd.f32 %v3345_v19, %v1474_v3  ;;  %v1608_v9 = vmax.f32 %v1544_v1, 0.0  ;;  %v1640_v10 = vmax.f32 %v1576_v2, 0.0 }
 0x20a   : > { %v1577_v8 = vadd.f32 %v3345_v19, %v1506_v4 }
 0x20b   : > { %v1609_v11 = vmax.f32 %v1545_v7, 0.0 }
 0x20c   : > { %v1641_v12 = vmax.f32 %v1577_v8, 0.0  ;;  %v1102_v13 = vpop.f32.mrb[56].mxu0  ;;  %v1230_v14 = vpop.f32.mrb[56].mxu1 }
 0x20d   : > { %v2410_v15 = vpack.c.bf16 %v1609_v11, %v1608_v9  ;;  %v1475_v18 = vmul.f32 %v3343_v17, %v1102_v13  ;;  %v1507_v20 = vmul.f32 %v3343_v17, %v1230_v14  ;;  %v1104_v21 = vpop.f32.mrb[57].mxu0  ;;  %v1232_v22 = vpop.f32.mrb[57].mxu1 }
 0x20e   : > { %v2490_v16 = vpack.c.bf16 %v1641_v12, %v1640_v10  ;;  %v1105_v23 = vpop.f32.mrb[58].mxu0  ;;  %v1233_v24 = vpop.f32.mrb[58].mxu1 }
 0x20f   : > { %2514 = vst [vmem:[%s3358_s25 + $0x68] sm:$0xff] %v2410_v15   ;;  %v1546_v25 = vadd.f32 %v3345_v19, %v1475_v18  ;;  %v1578_v26 = vadd.f32 %v3345_v19, %v1507_v20  ;;  %v1476_v27 = vmul.f32 %v3343_v17, %v1105_v23  ;;  %v1508_v28 = vmul.f32 %v3343_v17, %v1233_v24  ;;  %v1107_v29 = vpop.f32.mrb[59].mxu0  ;;  %v1235_v30 = vpop.f32.mrb[59].mxu1 }
 0x210   : > { %2530 = vst [vmem:[%s3358_s25 + $0xe8] sm:$0xff] %v2490_v16  }
 0x211   : > { %v1547_v31 = vadd.f32 %v3345_v19, %v1476_v27  ;;  %v1579_v32 = vadd.f32 %v3345_v19, %v1508_v28  ;;  %v1610_v33 = vmax.f32 %v1546_v25, 0.0  ;;  %v1642_v34 = vmax.f32 %v1578_v26, 0.0 }
 0x213   : > { %v1611_v35 = vmax.f32 %v1547_v31, 0.0  ;;  %v1643_v36 = vmax.f32 %v1579_v32, 0.0 }
 0x214   : > { %v1110_v37 = vpop.f32.mrb[60].mxu0  ;;  %v1238_v38 = vpop.f32.mrb[60].mxu1 }
 0x215   : > { %v2415_v39 = vpack.c.bf16 %v1611_v35, %v1610_v33  ;;  %v2495_v40 = vpack.c.bf16 %v1643_v36, %v1642_v34  ;;  %v1477_v41 = vmul.f32 %v3343_v17, %v1110_v37  ;;  %v1509_v42 = vmul.f32 %v3343_v17, %v1238_v38  ;;  %v1112_v43 = vpop.f32.mrb[61].mxu0  ;;  %v1240_v44 = vpop.f32.mrb[61].mxu1 }
 0x216   : > { %v1113_v45 = vpop.f32.mrb[62].mxu0  ;;  %v1241_v46 = vpop.f32.mrb[62].mxu1 }
 0x217   : > { %2515 = vst [vmem:[%s3358_s25 + $0x70] sm:$0xff] %v2415_v39   ;;  %2531 = vst [vmem:[%s3358_s25 + $0xf0] sm:$0xff] %v2495_v40   ;;  %v1548_v47 = vadd.f32 %v3345_v19, %v1477_v41  ;;  %v1580_v48 = vadd.f32 %v3345_v19, %v1509_v42  ;;  %v1478_v49 = vmul.f32 %v3343_v17, %v1113_v45  ;;  %v1115_v51 = vpop.f32.mrb[63].mxu0  ;;  %v1243_v52 = vpop.f32.mrb[63].mxu1 }
 0x218   : > { %v1510_v50 = vmul.f32 %v3343_v17, %v1241_v46 }
 0x219   : > { %v1549_v53 = vadd.f32 %v3345_v19, %v1478_v49  ;;  %v1612_v55 = vmax.f32 %v1548_v47, 0.0  ;;  %v1644_v56 = vmax.f32 %v1580_v48, 0.0 }
 0x21a   : > { %v1581_v54 = vadd.f32 %v3345_v19, %v1510_v50 }
 0x21b   : > { %v1613_v57 = vmax.f32 %v1549_v53, 0.0 }
 0x21c   : > { %v1645_v58 = vmax.f32 %v1581_v54, 0.0 }
 0x21d   : > { %v2420_v17 = vpack.c.bf16 %v1613_v57, %v1612_v55 }
 0x21e   : > { %v2500_v59 = vpack.c.bf16 %v1645_v58, %v1644_v56 }
 0x21f   : > { %2516 = vst [vmem:[%s3358_s25 + $0x78] sm:$0xff] %v2420_v17  }
 0x220   : > { %2532 = vst [vmem:[%s3358_s25 + $0xf8] sm:$0xff] %v2500_v59  }
 0x221   : > { %2904 = shalt.err (!%p2901_p13)
}
 0x222   : > { %s2905_s29 = scalar_lea.hbm %s3513_s6, 4096  ;;  %s2909_s8 = scalar_lea.hbm %s3569_s4, 200704 }
 0x223   : > { %p2906_p4 = scmp.ne.s32.totalorder %s3513_s6, %s2905_s29  ;;  %p2910_p11 = scmp.lt.u32.totalorder %s3513_s6, %s3569_s4 }
 0x224   : > { %p2911_p1 = scmp.lt.u32.totalorder %s2909_s8, %s2905_s29  ;;  %p2913_p12 = scmp.lt.u32.totalorder %s2905_s29, %s3513_s6 }
 0x225   : > { %p2907_p2 = pnand %p2906_p4, %p3171_p0 }
 0x226   : > { %p2912_p10 = por %p2911_p1, %p2910_p11 }
 0x227   : > { %p2908_p8 = pneg %p2907_p2 }
 0x228   : > { %p2914_p6 = por %p2913_p12, %p2912_p10 }
 0x22a   : > { %p2915_p3 = pnand %p2914_p6, %p2908_p8 }
 0x22c   : > { %2918 = shalt.err (!%p2915_p3)
}
 0x22d   : > { %s2993_s25 = smov 64   ;;  %s2994_s27 = smov 4  }
 0x22e   : > { %2579 = dma.vmem_to_hbm [thread:$0]  (%p3171_p0), %s3515_s24, 4096, %s3513_s6, %s1967_s18, %s2993_s25, %s2993_s25, %s2994_s27  }
 0x22f PF: > { %s3589_s22 = sld [smem:[#allocation16_spill]]  ;;  %p2606_p5 = scmp.ge.s32.totalorder %s2981_s20, 2 }
 0x230   : > { %s1996_s28 = sand.u32 1, %s2961_s15  }
 0x231   : > { %s1997_s7 = scalar_lea.sflag [#allocation5], %s1996_s28 }
 0x235   : > { %p3590_p7 = scmp.ne.s32.totalorder %s3589_s22, 0 }
 0x237   : > { %p2596_p9 = pnand %p2606_p5, %p3590_p7 }
 0x239   : > { %2956 = dma.done.wait (!%p2596_p9), %s1997_s7, 4096  }
 0x23a   : > { %2958 = vsyncadd (!%p2596_p9), %s1997_s7, 4294963200  ;;  %s22_s20 = sadd.s32 1, %s2981_s20   ;;  %s3591_s15 = smov %s2965_s16 }
 0x23b   : > { %p19_p13 = scmp.ge.s32.totalorder %s22_s20, 51   ;;  %s3592_s16 = smov %s2969_s17 }
 0x23c   : > { %s3593_s17 = smov %s3183_s11  ;;  %s3594_s18 = smov %s2977_s19 }
 0x23d   : > { %s3595_s19 = smov %s3597_s26  ;;  %21 = sbr.rel (!%p19_p13) target bundleno = 8 (0x8), region = 104 }
 0x244   :  { %2002 = vsyncpa [#allocation4], 1 }
 0x245   :  { %2004 = vsyncpa [#allocation4 + $0x1], 1 }
 0x246   :  { %2005 = vsyncpa [#allocation7], 1 }
 0x247   :  { %2006 = vsyncpa [#allocation10], 1 }
 0x248   :  { %2007 = vsyncpa [#allocation5], 1 }
 0x249   :  { %2009 = vsyncpa [#allocation5 + $0x1], 1 }

</bundles_post_ra>
